<compile_context>
chip_gen: v7x
topology: tpu7x:2x2x1
jax: 0.10.0
libtpu: 0.0.40
codegen_flags: <defaults>
</compile_context>

<pallas_src>
from functools import partial
import math

import jax
import jax.numpy as jnp
from jax.experimental import pallas as pl
from jax.experimental.pallas import tpu as pltpu


def _round_up(x, m):
    return (x + m - 1) // m * m


# ----------------------------------------------------------------------------
# Fused RPN head kernel:
#   im2col matmul 3x3 conv + bias + ReLU -> fused 1x1 convs -> paired softmax
# ----------------------------------------------------------------------------
def _rpn_head_kernel(p_ref, wc_ref, bc_ref, wh_ref, bh_ref, lin_ref, prob_ref):
    # p_ref:    (TR, 9*Cin) bf16   im2col patches for TR output pixels
    # wc_ref:   (9*Cin, 512) bf16  3x3 conv weight, tap-major rows
    # bc_ref:   (1, 512) f32       conv bias
    # wh_ref:   (512, 256) bf16    fused head weight (see wrapper for layout)
    # bh_ref:   (1, 256) f32       fused head bias
    # lin_ref:  (TR, 128) f32      [cls scores 0:18 | bbox 18:54 | zero pad]
    # prob_ref: (TR, 128) f32      [cls probs  0:18 | don't-care lanes]

    # 3x3 conv as a single big-K MXU matmul; bias + ReLU in f32.
    feat = jnp.dot(p_ref[...], wc_ref[...], preferred_element_type=jnp.float32)
    feat = jnp.maximum(feat + bc_ref[...], 0.0)

    # Fused 1x1 convs: one (TR,512) @ (512,256) matmul.
    out = jnp.dot(feat.astype(jnp.bfloat16), wh_ref[...],
                  preferred_element_type=jnp.float32) + bh_ref[...]
    lin = out[:, :128]          # vreg-aligned split (no lane shuffles)
    partner = out[:, 128:]      # cls scores with (bg,fg) channels swapped

    lin_ref[...] = lin

    # Pairwise softmax == softmax over {score, partner} per lane.  Computed on
    # the full 128 lanes (only lanes 0:18 are meaningful; the rest is finite
    # garbage that the wrapper never reads).  exp/reciprocal sit in the EUP.
    m = jnp.maximum(lin, partner)
    e0 = jnp.exp(lin - m)
    e1 = jnp.exp(partner - m)
    prob_ref[...] = e0 * pl.reciprocal(e0 + e1, approx=True)


@jax.jit
def rpn_forward(base_feat, w_conv, b_conv, w_cls, b_cls, w_bbox, b_bbox):
    """Eval-mode RPN.forward. base_feat is NCHW; returns NCHW outputs."""
    B, Cin, H, W = base_feat.shape
    HW = H * W
    K9 = 9 * Cin

    # ---- im2col in the wrapper (removes nine in-kernel slice copies and nine
    #      tiny-K matmuls).  TODO(synk): accept NHWC activations straight from
    #      the backbone to drop this NCHW->NHWC transpose round-trip.
    x = jnp.transpose(base_feat, (0, 2, 3, 1)).astype(jnp.float32)
    xp = jnp.pad(x, ((0, 0), (1, 1), (1, 1), (0, 0)))
    taps = [xp[:, dy:dy + H, dx:dx + W, :] for dy in range(3) for dx in range(3)]
    patches = jnp.stack(taps, axis=3).reshape(B, HW, K9).astype(jnp.bfloat16)

    # Spatial row tiling (pipelining + bounded per-step VMEM at prod sizes).
    TR = 512 if HW >= 512 else _round_up(HW, 8)
    HWp = _round_up(HW, TR)
    if HWp != HW:
        patches = jnp.pad(patches, ((0, 0), (0, HWp - HW), (0, 0)))

    # ---- weights -> matmul-friendly bf16, fused + lane-dense layouts
    wc = jnp.transpose(w_conv, (2, 3, 1, 0)).reshape(K9, 512).astype(jnp.bfloat16)
    bc = b_conv.reshape(1, 512).astype(jnp.float32)

    wcls = jnp.transpose(w_cls.reshape(18, 512), (1, 0))      # (512, 18)
    wbb = jnp.transpose(w_bbox.reshape(36, 512), (1, 0))      # (512, 36)
    wcls_sw = jnp.concatenate([wcls[:, 9:], wcls[:, :9]], axis=1)   # partner
    bcls_sw = jnp.concatenate([b_cls[9:], b_cls[:9]])
    wh = jnp.concatenate(
        [wcls, wbb, jnp.zeros((512, 74), jnp.float32),
         wcls_sw, jnp.zeros((512, 110), jnp.float32)], axis=1).astype(jnp.bfloat16)
    bh = jnp.concatenate(
        [b_cls, b_bbox, jnp.zeros((74,), jnp.float32),
         bcls_sw, jnp.zeros((110,), jnp.float32)]).reshape(1, 256).astype(jnp.float32)

    # TODO(synk): on v7x also mark the constant-index weight specs
    # pipeline_mode=pl.Buffered(1) to reclaim the double-buffered weight VMEM.
    lin, prob = pl.pallas_call(
        _rpn_head_kernel,
        out_shape=(
            jax.ShapeDtypeStruct((B, HWp, 128), jnp.float32),
            jax.ShapeDtypeStruct((B, HWp, 128), jnp.float32),
        ),
        grid_spec=pltpu.PrefetchScalarGridSpec(
            num_scalar_prefetch=0,
            grid=(B, HWp // TR),
            in_specs=[
                pl.BlockSpec((None, TR, K9), lambda b, t: (b, t, 0)),
                pl.BlockSpec((K9, 512), lambda b, t: (0, 0)),
                pl.BlockSpec((1, 512), lambda b, t: (0, 0)),
                pl.BlockSpec((512, 256), lambda b, t: (0, 0)),
                pl.BlockSpec((1, 256), lambda b, t: (0, 0)),
            ],
            out_specs=(
                pl.BlockSpec((None, TR, 128), lambda b, t: (b, t, 0)),
                pl.BlockSpec((None, TR, 128), lambda b, t: (b, t, 0)),
            ),
        ),
        compiler_params=pltpu.CompilerParams(
            dimension_semantics=("parallel", "parallel"),
            vmem_limit_bytes=64 * 1024 * 1024,
        ),
    )(patches, wc, bc, wh, bh)

    # Split the lane-dense outputs and return NCHW (PyTorch module layout).
    def to_nchw(a, c):
        return jnp.transpose(a.reshape(B, H, W, c), (0, 3, 1, 2))

    rpn_cls_score = to_nchw(lin[:, :HW, 0:18], 18)
    rpn_offsets = to_nchw(lin[:, :HW, 18:54], 36)
    rpn_cls_prob = to_nchw(prob[:, :HW, 0:18], 18)

    # TODO(synk): rois = self.RPN_proposal(...) — proposal layer not available.
    rpn_loss_cls = jnp.float32(0.0)
    rpn_loss_box = jnp.float32(0.0)
    return rpn_cls_prob, rpn_cls_score, rpn_offsets, rpn_loss_cls, rpn_loss_box


# ----------------------------------------------------------------------------
# _smooth_l1_loss (sum over dims [1,2,3], mean over batch) — blocked reduction
# ----------------------------------------------------------------------------
def _smooth_l1_kernel(pred_ref, tgt_ref, inw_ref, outw_ref, acc_ref,
                      *, sigma, batch):
    t = pl.program_id(0)

    @pl.when(t == 0)
    def _():
        acc_ref[...] = jnp.zeros_like(acc_ref)

    sigma_2 = sigma * sigma
    diff = pred_ref[...] - tgt_ref[...]
    in_diff = inw_ref[...] * diff
    abs_d = jnp.abs(in_diff)
    sign = (abs_d < (1.0 / sigma_2)).astype(jnp.float32)
    in_loss = (in_diff * in_diff) * (sigma_2 / 2.0) * sign \
        + (abs_d - 0.5 / sigma_2) * (1.0 - sign)
    out_loss = outw_ref[...] * in_loss
    acc_ref[...] += jnp.sum(out_loss, axis=0, keepdims=True)

    @pl.when(t == pl.num_programs(0) - 1)
    def _():
        # sum over dims [1,2,3] then mean over batch == total_sum / B
        acc_ref[...] = acc_ref[...] / batch


@partial(jax.jit, static_argnames=("sigma",))
def smooth_l1_loss(bbox_pred, bbox_targets, bbox_inside_weights,
                   bbox_outside_weights, sigma=1.0):
    B = bbox_pred.shape[0]
    N = math.prod(bbox_pred.shape)
    LANES = 512
    rows = _round_up(N, LANES) // LANES
    TR = 256 if rows >= 256 else _round_up(rows, 8)
    rows_p = _round_up(rows, TR)
    total = rows_p * LANES

    def prep(a):
        a = a.reshape(-1).astype(jnp.float32)
        # zero padding contributes 0 (diff = 0, inside/outside weights = 0)
        return jnp.pad(a, (0, total - N)).reshape(rows_p, LANES)

    kernel = partial(_smooth_l1_kernel, sigma=float(sigma), batch=float(B))
    acc = pl.pallas_call(
        kernel,
        out_shape=jax.ShapeDtypeStruct((1, LANES), jnp.float32),
        grid_spec=pltpu.PrefetchScalarGridSpec(
            num_scalar_prefetch=0,
            grid=(rows_p // TR,),
            in_specs=[pl.BlockSpec((TR, LANES), lambda i: (i, 0))] * 4,
            out_specs=pl.BlockSpec((1, LANES), lambda i: (0, 0)),
        ),
        compiler_params=pltpu.CompilerParams(
            dimension_semantics=("arbitrary",)),
    )(prep(bbox_pred), prep(bbox_targets),
      prep(bbox_inside_weights), prep(bbox_outside_weights))
    return jnp.sum(acc)


# ----------------------------------------------------------------------------
# Pure-JAX references (for correctness checking only)
# ----------------------------------------------------------------------------
def _ref_forward(base_feat, w_conv, b_conv, w_cls, b_cls, w_bbox, b_bbox):
    dn = ('NCHW', 'OIHW', 'NCHW')
    conv = jax.lax.conv_general_dilated(base_feat, w_conv, (1, 1),
                                        ((1, 1), (1, 1)), dimension_numbers=dn)
    feat = jnp.maximum(conv + b_conv[None, :, None, None], 0.0)
    score = jax.lax.conv_general_dilated(feat, w_cls, (1, 1),
                                         ((0, 0), (0, 0)), dimension_numbers=dn)
    score = score + b_cls[None, :, None, None]
    B, C, H, W = score.shape
    new = score.reshape(B, 2, (C * H) // 2, W)           # RPN.reshape(x, 2)
    soft = jax.nn.softmax(new, axis=1)
    prob = soft.reshape(B, C, H, W)                      # RPN.reshape(x, 18)
    bbox = jax.lax.conv_general_dilated(feat, w_bbox, (1, 1),
                                        ((0, 0), (0, 0)), dimension_numbers=dn)
    bbox = bbox + b_bbox[None, :, None, None]
    return prob, score, bbox


def _ref_smooth_l1(pred, tgt, inw, outw, sigma):
    s2 = sigma * sigma
    d = inw * (pred - tgt)
    a = jnp.abs(d)
    sign = (a < 1.0 / s2).astype(jnp.float32)
    loss = d * d * (s2 / 2.0) * sign + (a - 0.5 / s2) * (1.0 - sign)
    loss = outw * loss
    return jnp.mean(jnp.sum(loss, axis=(1, 2, 3)))


# ----------------------------------------------------------------------------
if __name__ == "__main__":
    key = jax.random.PRNGKey(0)
    kx, kw1, kb1, kw2, kb2, kw3, kb3, kt = jax.random.split(key, 8)

    # small shapes: din=16 input channels, 16x16 feature map, batch 2
    B, Cin, H, W = 2, 16, 16, 16
    base_feat = jax.random.normal(kx, (B, Cin, H, W), jnp.float32)

    # deterministic synthetic parameters (shapes from RPN.__init__)
    w_conv = jax.random.normal(kw1, (512, Cin, 3, 3), jnp.float32) * 0.05
    b_conv = jax.random.normal(kb1, (512,), jnp.float32) * 0.01
    w_cls = jax.random.normal(kw2, (18, 512, 1, 1), jnp.float32) * 0.05
    b_cls = jax.random.normal(kb2, (18,), jnp.float32) * 0.01
    w_bbox = jax.random.normal(kw3, (36, 512, 1, 1), jnp.float32) * 0.05
    b_bbox = jax.random.normal(kb3, (36,), jnp.float32) * 0.01

    prob, score, offsets, loss_cls, loss_box = rpn_forward(
        base_feat, w_conv, b_conv, w_cls, b_cls, w_bbox, b_bbox)
    jax.block_until_ready((prob, score, offsets))

    prob_r, score_r, offsets_r = _ref_forward(
        base_feat, w_conv, b_conv, w_cls, b_cls, w_bbox, b_bbox)
    assert prob.shape == (B, 18, H, W) and offsets.shape == (B, 36, H, W)
    assert jnp.allclose(prob, prob_r, atol=5e-2, rtol=5e-2)
    assert jnp.allclose(score, score_r, atol=5e-2, rtol=5e-2)
    assert jnp.allclose(offsets, offsets_r, atol=5e-2, rtol=5e-2)

    # smooth-L1 box-loss kernel, exercised with synthetic targets/weights
    # (the real targets come from anchor_target_layer, which is unavailable).
    kt1, kt2 = jax.random.split(kt, 2)
    tgt = jax.random.normal(kt1, offsets.shape, jnp.float32)
    inw = (jax.random.uniform(kt2, offsets.shape) > 0.5).astype(jnp.float32)
    outw = jnp.full(offsets.shape, 1.0 / (36 * H * W), jnp.float32)

    loss = smooth_l1_loss(offsets, tgt, inw, outw, sigma=3.0)
    jax.block_until_ready(loss)
    loss_r = _ref_smooth_l1(offsets, tgt, inw, outw, 3.0)
    assert jnp.allclose(loss, loss_r, atol=1e-4, rtol=1e-4)

    print("KERNEL_OK")
</pallas_src>

<mosaic_0001>
module attributes {stable_mosaic.version = 11 : i64} {
  func.func @_rpn_head_kernel(%arg0: i32, %arg1: i32, %arg2: memref<1x256x144xbf16, #tpu.memory_space<vmem>>, %arg3: memref<144x512xbf16, #tpu.memory_space<vmem>>, %arg4: memref<1x512xf32, #tpu.memory_space<vmem>>, %arg5: memref<512x256xbf16, #tpu.memory_space<vmem>>, %arg6: memref<1x256xf32, #tpu.memory_space<vmem>>, %arg7: memref<1x256x128xf32, #tpu.memory_space<vmem>>, %arg8: memref<1x256x128xf32, #tpu.memory_space<vmem>>) attributes {dimension_semantics = [#tpu.dimension_semantics<parallel>, #tpu.dimension_semantics<parallel>], iteration_bounds = array<i64: 2, 1>, scalar_prefetch = 0 : i64, scratch_operands = 0 : i64, tpu.core_type = #tpu.core_type<tc>, window_params = [{transform_indices = @transform_0, window_bounds = array<i64: 1, 256, 144>}, {pipeline_mode = #tpu.pipeline_mode<synchronous>, transform_indices = @transform_1, window_bounds = array<i64: 144, 512>}, {pipeline_mode = #tpu.pipeline_mode<synchronous>, transform_indices = @transform_2, window_bounds = array<i64: 1, 512>}, {pipeline_mode = #tpu.pipeline_mode<synchronous>, transform_indices = @transform_3, window_bounds = array<i64: 512, 256>}, {pipeline_mode = #tpu.pipeline_mode<synchronous>, transform_indices = @transform_4, window_bounds = array<i64: 1, 256>}, {transform_indices = @transform_5, window_bounds = array<i64: 1, 256, 128>}, {transform_indices = @transform_6, window_bounds = array<i64: 1, 256, 128>}]} {
    %c0 = arith.constant 0 : index
    %c0_0 = arith.constant 0 : index
    %c0_1 = arith.constant 0 : index
    %0 = vector.load %arg2[%c0, %c0_0, %c0_1] : memref<1x256x144xbf16, #tpu.memory_space<vmem>>, vector<1x256x144xbf16>
    %1 = vector.shape_cast %0 : vector<1x256x144xbf16> to vector<256x144xbf16>
    %c0_2 = arith.constant 0 : index
    %c0_3 = arith.constant 0 : index
    %2 = vector.load %arg3[%c0_2, %c0_3] : memref<144x512xbf16, #tpu.memory_space<vmem>>, vector<144x512xbf16>
    %cst = arith.constant dense<0.000000e+00> : vector<256x512xf32>
    %3 = tpu.matmul %1, %2, %cst {dimension_numbers = #tpu.dot_dimension_numbers<[1], [0], [0], [1], [0, 0, 1, 1], [], []>} : vector<256x144xbf16>, vector<144x512xbf16>, vector<256x512xf32> -> vector<256x512xf32>
    %c0_4 = arith.constant 0 : index
    %c0_5 = arith.constant 0 : index
    %4 = vector.load %arg4[%c0_4, %c0_5] : memref<1x512xf32, #tpu.memory_space<vmem>>, vector<1x512xf32>
    %5 = vector.broadcast %4 : vector<1x512xf32> to vector<256x512xf32>
    %6 = arith.addf %3, %5 : vector<256x512xf32>
    %cst_6 = arith.constant 0.000000e+00 : f32
    %7 = vector.broadcast %cst_6 : f32 to vector<256x512xf32>
    %8 = arith.maximumf %6, %7 : vector<256x512xf32>
    %9 = arith.truncf %8 : vector<256x512xf32> to vector<256x512xbf16>
    %c0_7 = arith.constant 0 : index
    %c0_8 = arith.constant 0 : index
    %10 = vector.load %arg5[%c0_7, %c0_8] : memref<512x256xbf16, #tpu.memory_space<vmem>>, vector<512x256xbf16>
    %cst_9 = arith.constant dense<0.000000e+00> : vector<256x256xf32>
    %11 = tpu.matmul %9, %10, %cst_9 {dimension_numbers = #tpu.dot_dimension_numbers<[1], [0], [0], [1], [0, 0, 1, 1], [], []>} : vector<256x512xbf16>, vector<512x256xbf16>, vector<256x256xf32> -> vector<256x256xf32>
    %c0_10 = arith.constant 0 : index
    %c0_11 = arith.constant 0 : index
    %12 = vector.load %arg6[%c0_10, %c0_11] : memref<1x256xf32, #tpu.memory_space<vmem>>, vector<1x256xf32>
    %13 = vector.broadcast %12 : vector<1x256xf32> to vector<256x256xf32>
    %14 = arith.addf %11, %13 : vector<256x256xf32>
    %15 = vector.extract_strided_slice %14 {offsets = [0, 0], sizes = [256, 128], strides = [1, 1]} : vector<256x256xf32> to vector<256x128xf32>
    %16 = vector.extract_strided_slice %14 {offsets = [0, 128], sizes = [256, 128], strides = [1, 1]} : vector<256x256xf32> to vector<256x128xf32>
    %c0_12 = arith.constant 0 : index
    %c0_13 = arith.constant 0 : index
    %c0_14 = arith.constant 0 : index
    %17 = vector.load %arg7[%c0_12, %c0_13, %c0_14] : memref<1x256x128xf32, #tpu.memory_space<vmem>>, vector<1x256x128xf32>
    %18 = vector.shape_cast %17 : vector<1x256x128xf32> to vector<256x128xf32>
    %19 = vector.shape_cast %15 : vector<256x128xf32> to vector<1x256x128xf32>
    tpu.vector_store %arg7[%c0_12, %c0_13, %c0_14], %19 {strides = array<i32>} : memref<1x256x128xf32, #tpu.memory_space<vmem>>, vector<1x256x128xf32>,
    %20 = arith.maximumf %15, %16 : vector<256x128xf32>
    %21 = arith.subf %15, %20 : vector<256x128xf32>
    %22 = math.exp %21 : vector<256x128xf32>
    %23 = arith.subf %16, %20 : vector<256x128xf32>
    %24 = math.exp %23 : vector<256x128xf32>
    %25 = arith.addf %22, %24 : vector<256x128xf32>
    %26 = tpu.reciprocal %25 {approx = true} : vector<256x128xf32> -> vector<256x128xf32>
    %27 = arith.mulf %22, %26 : vector<256x128xf32>
    %c0_15 = arith.constant 0 : index
    %c0_16 = arith.constant 0 : index
    %c0_17 = arith.constant 0 : index
    %28 = vector.load %arg8[%c0_15, %c0_16, %c0_17] : memref<1x256x128xf32, #tpu.memory_space<vmem>>, vector<1x256x128xf32>
    %29 = vector.shape_cast %28 : vector<1x256x128xf32> to vector<256x128xf32>
    %30 = vector.shape_cast %27 : vector<256x128xf32> to vector<1x256x128xf32>
    tpu.vector_store %arg8[%c0_15, %c0_16, %c0_17], %30 {strides = array<i32>} : memref<1x256x128xf32, #tpu.memory_space<vmem>>, vector<1x256x128xf32>,
    return
  }
  func.func @transform_0(%arg0: i32, %arg1: i32) -> (i32, i32, i32) {
    %c0_i32 = arith.constant 0 : i32
    %c0_i32_0 = arith.constant 0 : i32
    return %arg0, %arg1, %c0_i32 : i32, i32, i32
  }
  func.func @transform_1(%arg0: i32, %arg1: i32) -> (i32, i32) {
    %c0_i32 = arith.constant 0 : i32
    %c0_i32_0 = arith.constant 0 : i32
    %c0_i32_1 = arith.constant 0 : i32
    return %c0_i32, %c0_i32_0 : i32, i32
  }
  func.func @transform_2(%arg0: i32, %arg1: i32) -> (i32, i32) {
    %c0_i32 = arith.constant 0 : i32
    %c0_i32_0 = arith.constant 0 : i32
    %c0_i32_1 = arith.constant 0 : i32
    return %c0_i32, %c0_i32_0 : i32, i32
  }
  func.func @transform_3(%arg0: i32, %arg1: i32) -> (i32, i32) {
    %c0_i32 = arith.constant 0 : i32
    %c0_i32_0 = arith.constant 0 : i32
    %c0_i32_1 = arith.constant 0 : i32
    return %c0_i32, %c0_i32_0 : i32, i32
  }
  func.func @transform_4(%arg0: i32, %arg1: i32) -> (i32, i32) {
    %c0_i32 = arith.constant 0 : i32
    %c0_i32_0 = arith.constant 0 : i32
    %c0_i32_1 = arith.constant 0 : i32
    return %c0_i32, %c0_i32_0 : i32, i32
  }
  func.func @transform_5(%arg0: i32, %arg1: i32) -> (i32, i32, i32) {
    %c0_i32 = arith.constant 0 : i32
    %c0_i32_0 = arith.constant 0 : i32
    return %arg0, %arg1, %c0_i32 : i32, i32, i32
  }
  func.func @transform_6(%arg0: i32, %arg1: i32) -> (i32, i32, i32) {
    %c0_i32 = arith.constant 0 : i32
    %c0_i32_0 = arith.constant 0 : i32
    return %arg0, %arg1, %c0_i32 : i32, i32, i32
  }
}

</mosaic_0001>

<bundles_post_ra>
// kernel: rpn_forward.1
= control target key start
LH: loop header
LB: loop body
LE: loop exit
PB: predicated region body
PF: predicated region fallthrough
CT: control target
= control target key end

     0   :  { %s4722_s0 = inlined_call_operand.hbm [shape: bf16[2,256,144], index: 0, kind: input, shape index: {}]   ;;  %s4723_s1 = inlined_call_operand.hbm [shape: bf16[144,512], index: 1, kind: input, shape index: {}]   ;;  %s4724_s2 = inlined_call_operand.hbm [shape: f32[1,512], index: 2, kind: input, shape index: {}]   ;;  %s4725_s3 = inlined_call_operand.hbm [shape: bf16[512,256], index: 3, kind: input, shape index: {}]   ;;  %s4726_s4 = inlined_call_operand.hbm [shape: f32[1,256], index: 4, kind: input, shape index: {}]   ;;  %s4727_s5 = inlined_call_operand.hbm [shape: f32[2,256,128], index: 5, kind: output, shape index: {0}]   ;;  %s4728_s6 = inlined_call_operand.hbm [shape: f32[2,256,128], index: 6, kind: output, shape index: {1}]  }
   0x1   :  { %4735 = sst [smem:[#allocation21_spill]] %s4723_s1 }
   0x2   :  { %12 = vsyncpa [#allocation3], 0 }
   0x3   :  { %14 = vsyncpa [#allocation3 + $0x1], 0 }
   0x4   :  { %15 = vsyncpa [#allocation6], 0 }
   0x5   :  { %16 = vsyncpa [#allocation9], 0 }
   0x6   :  { %17 = vsyncpa [#allocation4], 0 }
   0x7   :  { %19 = vsyncpa [#allocation4 + $0x1], 0 }
   0x8   :  { %20 = vsyncpa [#allocation13], 0 }
   0x9   :  { %22 = vsyncpa [#allocation13 + $0x1], 0  ;;  %s3906_s21 = smov 0   ;;  %s3908_s22 = smov 0  }
   0xa   :  { %s3910_s23 = smov 0   ;;  %s3912_s24 = smov 0  }
   0xb   :  { %s3914_s25 = smov 0   ;;  %s3916_s26 = smov 0  }
   0xc LB: > { %4736 = sst [smem:[#allocation19_spill]] %s3836_s21  ;;  %s2766_s27 = sadd.s32 4294967295, %s3856_s26   ;;  %s3856_s26 = sphi %s3916_s26, %s28_s26   ;;  %s3852_s25 = sphi %s3914_s25, %s4760_s25   ;;  %s3848_s24 = sphi %s3912_s24, %s4759_s24   ;;  %s3844_s23 = sphi %s3910_s23, %s4758_s23   ;;  %s3840_s22 = sphi %s3908_s22, %s4757_s22   ;;  %s3836_s21 = sphi %s3906_s21, %s4756_s21  }
   0xd   : > { %s2767_s28 = sadd.s32 4294967294, %s3856_s26   ;;  %p62_p0 = scmp.ne.s32.totalorder %s3840_s22, %s3836_s21 }
   0xe   : > { %p3940_p1 = scmp.eq.s32.totalorder %s2766_s27, 0  ;;  %p3944_p2 = scmp.eq.s32.totalorder %s2766_s27, 1 }
   0xf   : > { %p178_p3 = scmp.eq.s32.totalorder %s2767_s28, 1  ;;  %p2768_p5 = scmp.ge.s32.totalorder %s3856_s26, 1 }
  0x10   : > { %s4737_s29 = scalar_select %p3940_p1, 1, 0 }
  0x11   : > { %s4738_s30 = scalar_select %p3944_p2, 1, 0 }
  0x12   : > { %p3950_p4 = por %p3940_p1, %p62_p0  ;;  %p3955_p6 = por %p178_p3, %p62_p0 }
  0x13   : > { %p213_p7 = scmp.lt.s32.totalorder %s3856_s26, 3  ;;  %s3858_s10 = smov [#allocation5]  }
  0x14   : > { %s4739_s7 = scalar_select %p3950_p4, 1, 0 }
  0x15   : > { %s4740_s8 = scalar_select %p3955_p6, 1, 0 }
  0x16   : > { %p3960_p8 = pnand %p2768_p5, %p213_p7  ;;  %s225_s11 = sshll.u32 %s3858_s10, 4  ;;  %s3964_s11 = int_to_ptr.vmem [resolvable:$true] %s225_s11 }
  0x17   : > { %4741 = sst [smem:[#allocation20_spill]] %s4740_s8  ;;  %s3859_s13 = smov [#allocation8]  }
  0x18   : > { %s4742_s9 = scalar_select %p3960_p8, 1, 0 }
  0x19   : > { %p3110_p9 = pneg %p3960_p8  ;;  %s249_s14 = sshll.u32 %s3859_s13, 4  ;;  %s3975_s14 = int_to_ptr.vmem [resolvable:$true] %s249_s14 }
  0x1a   : > { %s4744_s1 = sld [smem:[#allocation21_spill]] }
  0x1b   : > { %p3971_p11 = pnand %p3110_p9, %p3940_p1 }
  0x1d   : > { %p3985_p13 = pneg %p3971_p11 }
  0x20   : > { %s3592_s17 = scalar_lea.hbm %s4744_s1, 4608 }
  0x21   : > { %p3593_p12 = scmp.ne.s32.totalorder %s4744_s1, %s3592_s17  ;;  %p3599_p5 = scmp.lt.u32.totalorder %s3592_s17, %s4744_s1 }
  0x23   : > { %p3595_p0 = pnand %p3985_p13, %p3593_p12 }
  0x25   : > { %p3596_p3 = pneg %p3595_p0 }
  0x27   : > { %p3601_p7 = pnand %p3599_p5, %p3596_p3 }
  0x29   : > { %3604 = shalt.err (!%p3601_p7)
}
  0x2a   : > { %s3605_s10 = scalar_lea.vmem %s3964_s11, 4608  ;;  %p3613_p1 = scmp.lt.s32.totalorder %s3964_s11, %s3964_s11 }
  0x2b   : > { %p3606_p9 = scmp.ne.s32.totalorder %s3964_s11, %s3605_s10  ;;  %p3614_p4 = scmp.lt.s32.totalorder %s3605_s10, %s3605_s10 }
  0x2d   : > { %p3608_p10 = pnand %p3606_p9, %p3985_p13  ;;  %p3615_p12 = por %p3614_p4, %p3613_p1 }
  0x2f   : > { %p3609_p6 = pneg %p3608_p10 }
  0x31   : > { %p3616_p0 = pnand %p3615_p12, %p3609_p6 }
  0x33   : > { %3619 = shalt.err (!%p3616_p0)
}
  0x34   : > { %s3860_s13 = smov 256   ;;  %s3861_s15 = smov 16  }
  0x35   : > { %3113 = dma.hbm_to_vmem [thread:$0]  (!%p3971_p11), %s4744_s1, 4608, %s3964_s11, [#allocation6], %s3860_s13, %s3860_s13, %s3861_s15  }
  0x36   : > { %s3620_s27 = scalar_lea.hbm %s4725_s3, 8192 }
  0x37   : > { %p3621_p1 = scmp.ne.s32.totalorder %s4725_s3, %s3620_s27  ;;  %p3627_p10 = scmp.lt.u32.totalorder %s3620_s27, %s4725_s3 }
  0x39   : > { %p3623_p4 = pnand %p3621_p1, %p3985_p13 }
  0x3b   : > { %p3624_p6 = pneg %p3623_p4 }
  0x3d   : > { %p3629_p3 = pnand %p3627_p10, %p3624_p6 }
  0x3f   : > { %3632 = shalt.err (!%p3629_p3)
}
  0x40   : > { %s3633_s11 = scalar_lea.vmem %s3975_s14, 8192  ;;  %p3641_p12 = scmp.lt.s32.totalorder %s3975_s14, %s3975_s14 }
  0x41   : > { %p3634_p5 = scmp.ne.s32.totalorder %s3975_s14, %s3633_s11  ;;  %p3642_p0 = scmp.lt.s32.totalorder %s3633_s11, %s3633_s11 }
  0x43   : > { %p3636_p7 = pnand %p3634_p5, %p3985_p13  ;;  %p3643_p1 = por %p3642_p0, %p3641_p12 }
  0x45   : > { %p3637_p9 = pneg %p3636_p7 }
  0x47   : > { %p3644_p4 = pnand %p3643_p1, %p3637_p9 }
  0x49   : > { %3647 = shalt.err (!%p3644_p4)
}
  0x4a   : > { %s3862_s8 = smov 128   ;;  %s3863_s21 = smov 8  }
  0x4b   : > { %3119 = dma.hbm_to_vmem [thread:$0]  (!%p3971_p11), %s4725_s3, 8192, %s3975_s14, [#allocation9], %s3862_s8, %s3862_s8, %s3863_s21  }
  0x4c   : > { %s3864_s16 = smov [#allocation7]   ;;  %s3865_s18 = smov [#allocation10]  }
  0x4d   : > { %s239_s17 = sshll.u32 %s3864_s16, 4  ;;  %s263_s19 = sshll.u32 %s3865_s18, 4  ;;  %s240_s17 = int_to_ptr.vmem [resolvable:$true] %s239_s17  ;;  %s4032_s19 = int_to_ptr.vmem [resolvable:$true] %s263_s19 }
  0x4e   : > { %s3648_s10 = scalar_lea.hbm %s4724_s2, 64 }
  0x4f   : > { %p3649_p6 = scmp.ne.s32.totalorder %s4724_s2, %s3648_s10  ;;  %p3655_p5 = scmp.lt.u32.totalorder %s3648_s10, %s4724_s2 }
  0x51   : > { %p3651_p10 = pnand %p3649_p6, %p3985_p13 }
  0x53   : > { %p3652_p3 = pneg %p3651_p10 }
  0x55   : > { %p3657_p7 = pnand %p3655_p5, %p3652_p3 }
  0x57   : > { %3660 = shalt.err (!%p3657_p7)
}
  0x58   : > { %s3661_s15 = scalar_lea.vmem %s240_s17, 64  ;;  %p3669_p1 = scmp.lt.s32.totalorder %s240_s17, %s240_s17 }
  0x59   : > { %p3662_p9 = scmp.ne.s32.totalorder %s240_s17, %s3661_s15  ;;  %p3670_p4 = scmp.lt.s32.totalorder %s3661_s15, %s3661_s15 }
  0x5b   : > { %p3664_p12 = pnand %p3662_p9, %p3985_p13  ;;  %p3671_p8 = por %p3670_p4, %p3669_p1 }
  0x5d   : > { %p3665_p0 = pneg %p3664_p12 }
  0x5f   : > { %p3672_p2 = pnand %p3671_p8, %p3665_p0 }
  0x61   : > { %3675 = shalt.err (!%p3672_p2)
}
  0x62   : > { %3116 = dma.hbm_to_vmem [thread:$0]  (!%p3971_p11), %s4724_s2, 64, %s240_s17, [#allocation6]  }
  0x63   : > { %s3676_s28 = scalar_lea.hbm %s4726_s4, 32 }
  0x64   : > { %p3677_p6 = scmp.ne.s32.totalorder %s4726_s4, %s3676_s28  ;;  %p3683_p2 = scmp.lt.u32.totalorder %s3676_s28, %s4726_s4 }
  0x66   : > { %p3679_p10 = pnand %p3677_p6, %p3985_p13 }
  0x68   : > { %p3680_p3 = pneg %p3679_p10 }
  0x6a   : > { %p3685_p8 = pnand %p3683_p2, %p3680_p3 }
  0x6c   : > { %3688 = shalt.err (!%p3685_p8)
}
  0x6d   : > { %s3689_s17 = scalar_lea.vmem %s4032_s19, 32  ;;  %p3697_p12 = scmp.lt.s32.totalorder %s4032_s19, %s4032_s19 }
  0x6e   : > { %p3690_p5 = scmp.ne.s32.totalorder %s4032_s19, %s3689_s17  ;;  %p3698_p0 = scmp.lt.s32.totalorder %s3689_s17, %s3689_s17 }
  0x70   : > { %p3692_p7 = pnand %p3690_p5, %p3985_p13  ;;  %p3699_p1 = por %p3698_p0, %p3697_p12 }
  0x72   : > { %p3693_p9 = pneg %p3692_p7 }
  0x74   : > { %p3700_p4 = pnand %p3699_p1, %p3693_p9 }
  0x76   : > { %3703 = shalt.err (!%p3700_p4)
}
  0x77   : > { %3122 = dma.hbm_to_vmem [thread:$0]  (!%p3971_p11), %s4726_s4, 32, %s4032_s19, [#allocation9]  }
  0x78   : > { %s40_s20 = sadd.s32 1, %s3852_s25  ;;  %s49_s16 = sadd.s32 1, %s3844_s23 }
  0x79   : > { %p42_p13 = scmp.ge.s32.totalorder %s40_s20, 2  ;;  %p56_p6 = scmp.ne.s32.totalorder %s3844_s23, %s3840_s22 }
  0x7a   : > { %p57_p10 = scmp.eq.s32.totalorder %s3856_s26, 0  ;;  %p3138_p3 = scmp.lt.s32.totalorder %s3856_s26, 2 }
  0x7b   : > { %s4762_s20 = smov (%p42_p13, %s40_s20), 0  ;;  %p4746_p8 = scmp.ne.s32.totalorder %s4738_s30, 0 }
  0x7c   : > { %p58_p2 = por %p57_p10, %p56_p6  ;;  %s44_s18 = ssub.s32 %s3852_s25, %s4762_s20 }
  0x7d   : > { %p4085_p5 = por %p4746_p8, %p56_p6  ;;  %s274_s27 = sand.u32 1, %s3844_s23  }
  0x7e   : > { %p47_p7 = scmp.eq.s32.totalorder %s44_s18, 0  ;;  %s2774_s19 = sshll.u32 %s274_s27, 8 }
  0x7f   : > { %s2957_s28 = sshll.u32 %s3852_s25, 12  ;;  %s278_s30 = scalar_lea.vmem [#allocation2], %s2774_s19 }
  0x80   : > { %s4094_s10 = scalar_select %p47_p7, %s3844_s23, %s49_s16  }
  0x81   : > { %s4099_s14 = scalar_lea.hbm %s4722_s0, %s2957_s28  ;;  %s288_s17 = sshll.u32 %s278_s30, 4  ;;  %s4107_s17 = int_to_ptr.vmem [resolvable:$true] %s288_s17 }
  0x82   : > { %p4103_p11 = pnand %p3138_p3, %p58_p2  ;;  %s4109_s1 = scalar_lea.sflag [#allocation3], %s274_s27 }
  0x83   : > { %s3704_s16 = scalar_lea.hbm %s4099_s14, 4096  ;;  %s3709_s28 = scalar_lea.hbm %s4722_s0, 8192 }
  0x84   : > { %p3705_p9 = scmp.ne.s32.totalorder %s4099_s14, %s3704_s16  ;;  %p3706_p12 = pneg %p4103_p11 }
  0x85   : > { %p3710_p4 = scmp.lt.u32.totalorder %s4099_s14, %s4722_s0  ;;  %p3711_p13 = scmp.lt.u32.totalorder %s3709_s28, %s3704_s16 }
  0x86   : > { %p3707_p0 = pnand %p3706_p12, %p3705_p9  ;;  %p3713_p10 = scmp.lt.u32.totalorder %s3704_s16, %s4099_s14 }
  0x87   : > { %p3712_p6 = por %p3711_p13, %p3710_p4 }
  0x88   : > { %p3708_p1 = pneg %p3707_p0 }
  0x89   : > { %p3714_p3 = por %p3713_p10, %p3712_p6 }
  0x8b   : > { %p3715_p2 = pnand %p3714_p3, %p3708_p1 }
  0x8d   : > { %3718 = shalt.err (!%p3715_p2)
}
  0x8e   : > { %s3719_s27 = scalar_lea.vmem %s4107_s17, 4096  ;;  %s3866_s30 = smov [#allocation2]  }
  0x8f   : > { %p3720_p8 = scmp.ne.s32.totalorder %s4107_s17, %s3719_s27  ;;  %s3724_s18 = sshll.u32 %s3866_s30, 4  ;;  %s3725_s18 = int_to_ptr.vmem [resolvable:$false] %s3724_s18 }
  0x90   : > { %s3726_s19 = scalar_lea.vmem %s3725_s18, 8192  ;;  %p3727_p0 = scmp.lt.s32.totalorder %s4107_s17, %s3725_s18 }
  0x91   : > { %p3722_p7 = pnand %p3720_p8, %p3706_p12  ;;  %p3728_p4 = scmp.lt.s32.totalorder %s3726_s19, %s3719_s27 }
  0x93   : > { %p3723_p9 = pneg %p3722_p7  ;;  %p3729_p13 = por %p3728_p4, %p3727_p0 }
  0x95   : > { %p3730_p6 = pnand %p3729_p13, %p3723_p9 }
  0x97   : > { %3733 = shalt.err (!%p3730_p6)
}
  0x98   : > { %3126 = dma.hbm_to_vmem [thread:$0]  (!%p4103_p11), %s4099_s14, 4096, %s4107_s17, %s4109_s1, %s3862_s8, %s3862_s8, %s3863_s21  }
  0x99   : > { %p4749_p12 = scmp.ne.s32.totalorder %s4742_s9, 0 }
  0x9a   : > { %s4143_s16 = sand.u32 (!%p4749_p12), 1, %s3840_s22   ;;  %p4750_p1 = scmp.ne.s32.totalorder (!%p4749_p12), %s4739_s7, 0 }
  0x9b   : > { %300 = sbr.rel (%p4749_p12) target bundleno = 829 (0x33d), region = 40  ;;  %s4146_s28 = sshll.u32 (!%p4749_p12), %s4143_s16, 8 }
  0x9c   : > { %s303_s15 = scalar_lea.sflag (!%p4749_p12), [#allocation3], %s4143_s16  ;;  %s4150_s11 = scalar_lea.vmem (!%p4749_p12), [#allocation2], %s4146_s28 }
  0xa2   : > { %3815 = dma.done.wait (%p4750_p1), %s303_s15, 4096  }
  0xa3   : > { %3817 = vsyncadd (%p4750_p1), %s303_s15, 4294963200  ;;  %p4751_p11 = scmp.ne.s32.totalorder %s4737_s29, 0 }
  0xa5   : > { %3819 = dma.done.wait (%p4751_p11), [#allocation6], 4672  }
  0xa6   : > { %3821 = vsyncadd (%p4751_p11), [#allocation6], 4294962624 }
  0xa7   : > { %3823 = dma.done.wait (%p4751_p11), [#allocation9], 8224  }
  0xa8   : > { %3825 = vsyncadd (%p4751_p11), [#allocation9], 4294959072  ;;  %v3202_v0 = vld [vmem:[#allocation5 + $0x4] ss:$16 sps:$4 sm:$0xff]   ;;  %v3204_v1 = vld [vmem:[#allocation5 + $0xc] ss:$16 sps:$4 sm:$0xff]  }
  0xa9   : > { %823 = vmatprep.subr.bf16.mxu0 %v3202_v0  ;;  %v3206_v2 = vld [vmem:[#allocation5] ss:$16 sps:$4 sm:$0xff]   ;;  %v3207_v3 = vld [vmem:[#allocation5 + $0x8] ss:$16 sps:$4 sm:$0xff]   ;;  %1016 = vmatprep.subr.bf16.mxu1 %v3204_v1  ;;  %v3208_v4 = vld [vmem:[#allocation5 + $0x24] ss:$16 sps:$4 sm:$0xff]  }
  0xaa   : > { %824 = vmatpush1.bf16.msra.mxu0 %v3206_v2  ;;  %1017 = vmatpush1.bf16.msra.mxu1 %v3207_v3  ;;  %v3210_v5 = vld [vmem:[#allocation5 + $0x2c] ss:$16 sps:$4 sm:$0xff]   ;;  %v3212_v6 = vld [vmem:[#allocation5 + $0x20] ss:$16 sps:$4 sm:$0xff]   ;;  %v3213_v7 = vld [vmem:[#allocation5 + $0x28] ss:$16 sps:$4 sm:$0xff]  }
  0xab   : > { %825 = vmatprep.subr.bf16.mxu0 %v3208_v4  ;;  %1018 = vmatprep.subr.bf16.mxu1 %v3210_v5  ;;  %v3214_v8 = vld [vmem:[#allocation5 + $0x44] ss:$16 sps:$4 sm:$0xff]   ;;  %v3216_v9 = vld [vmem:[#allocation5 + $0x4c] ss:$16 sps:$4 sm:$0xff]   ;;  %v3218_v10 = vld [vmem:[#allocation5 + $0x40] ss:$16 sps:$4 sm:$0xff]  }
  0xac   : > { %v3219_v11 = vld [vmem:[#allocation5 + $0x48] ss:$16 sps:$4 sm:$0xff]   ;;  %v3220_v12 = vld [vmem:[#allocation5 + $0x64] ss:$16 sps:$4 sm:$0xff]   ;;  %v3222_v13 = vld [vmem:[#allocation5 + $0x6c] ss:$16 sps:$4 sm:$0xff]  }
  0xad   : > { %v3224_v14 = vld [vmem:[#allocation5 + $0x60] ss:$16 sps:$4 sm:$0xff]   ;;  %v3225_v15 = vld [vmem:[#allocation5 + $0x68] ss:$16 sps:$4 sm:$0xff]   ;;  %v3226_v16 = vld [vmem:[#allocation5 + $0x84] ss:$16 sps:$4 sm:$0xff]  }
  0xae   : > { %826 = vmatpush1.bf16.msra.mxu0 %v3212_v6  ;;  %1019 = vmatpush1.bf16.msra.mxu1 %v3213_v7  ;;  %v3228_v17 = vld [vmem:[#allocation5 + $0x8c] ss:$16 sps:$4 sm:$0xff]   ;;  %v3230_v18 = vld [vmem:[#allocation5 + $0x80] ss:$16 sps:$4 sm:$0xff]   ;;  %v3231_v19 = vld [vmem:[#allocation5 + $0x88] ss:$16 sps:$4 sm:$0xff]  }
  0xaf   : > { %827 = vmatprep.subr.bf16.mxu0 %v3214_v8  ;;  %1020 = vmatprep.subr.bf16.mxu1 %v3216_v9  ;;  %v3232_v20 = vld [vmem:[#allocation5 + $0xa4] ss:$16 sps:$4 sm:$0xff]   ;;  %v3234_v21 = vld [vmem:[#allocation5 + $0xac] ss:$16 sps:$4 sm:$0xff]   ;;  %v3236_v22 = vld [vmem:[#allocation5 + $0xa0] ss:$16 sps:$4 sm:$0xff]  }
  0xb0   : > { %v3237_v23 = vld [vmem:[#allocation5 + $0xa8] ss:$16 sps:$4 sm:$0xff]   ;;  %v3238_v24 = vld [vmem:[#allocation5 + $0xc4] ss:$16 sps:$4 sm:$0xff]   ;;  %v3240_v25 = vld [vmem:[#allocation5 + $0xcc] ss:$16 sps:$4 sm:$0xff]  }
  0xb1   : > { %v3242_v26 = vld [vmem:[#allocation5 + $0xc0] ss:$16 sps:$4 sm:$0xff]   ;;  %v3243_v27 = vld [vmem:[#allocation5 + $0xc8] ss:$16 sps:$4 sm:$0xff]   ;;  %v3244_v28 = vld [vmem:[#allocation5 + $0xe4] ss:$16 sps:$4 sm:$0xff]  }
  0xb2   : > { %828 = vmatpush1.bf16.msra.mxu0 %v3218_v10  ;;  %1021 = vmatpush1.bf16.msra.mxu1 %v3219_v11  ;;  %v3246_v29 = vld [vmem:[#allocation5 + $0xec] ss:$16 sps:$4 sm:$0xff]   ;;  %vm774_vm0 = vcmask 130048   ;;  %v3248_v31 = vld [vmem:[#allocation5 + $0xe0] ss:$16 sps:$4 sm:$0xff]   ;;  %s4387_s29 = scalar_lea.vmem [#allocation11], %s4146_s28 }
  0xb3   : > { %829 = vmatprep.subr.bf16.mxu0 %v3220_v12  ;;  %1022 = vmatprep.subr.bf16.mxu1 %v3222_v13  ;;  %v3258_v30 = vld [vmem:[%s4150_s11 + $0x4] ss:$8 sps:$4 sm:$0xff]   ;;  %v3249_v32 = vld [vmem:[#allocation5 + $0xe8] ss:$16 sps:$4 sm:$0xff]   ;;  %v3254_v35 = vld [vmem:[#allocation5 + $0x100] ss:$16 sps:$4 sm:$0xff]  }
  0xb4   : > { %2853 = vmatprep.mubr.msk.bf16.mxu0 %vm774_vm0, %v3258_v30  ;;  %2869 = vmatprep.mubr.msk.bf16.mxu1 %vm774_vm0, %v3258_v30  ;;  %v3250_v33 = vld [vmem:[#allocation5 + $0x104] ss:$16 sps:$4 sm:$0xff]   ;;  %v3252_v34 = vld [vmem:[#allocation5 + $0x10c] ss:$16 sps:$4 sm:$0xff]   ;;  %v3255_v36 = vld [vmem:[#allocation5 + $0x108] ss:$16 sps:$4 sm:$0xff]  }
  0xb5   : > { %v3256_v37 = vld [vmem:[%s4150_s11] ss:$8 sps:$4 sm:$0xff]   ;;  %v3259_v38 = vld [vmem:[%s4150_s11 + $0x14] ss:$8 sps:$4 sm:$0xff]   ;;  %v3292_v39 = vld [vmem:[#allocation8] ss:$8 sps:$4 sm:$0xff]  }
  0xb6   : > { %830 = vmatpush1.bf16.msra.mxu0 %v3224_v14  ;;  %1023 = vmatpush1.bf16.msra.mxu1 %v3225_v15  ;;  %v3294_v40 = vld [vmem:[#allocation8 + $0x4] ss:$8 sps:$4 sm:$0xff]   ;;  %v3297_v42 = vld [vmem:[#allocation8 + $0x100] ss:$8 sps:$4 sm:$0xff]   ;;  %v3303_v45 = vld [vmem:[#allocation8 + $0x14] ss:$8 sps:$4 sm:$0xff]  }
  0xb7   : > { %831 = vmatprep.subr.bf16.mxu0 %v3226_v16  ;;  %1024 = vmatprep.subr.bf16.mxu1 %v3228_v17  ;;  %v3261_v41 = vld [vmem:[%s4150_s11 + $0x10] ss:$8 sps:$4 sm:$0xff]   ;;  %v3262_v44 = vld [vmem:[%s4150_s11 + $0x24] ss:$8 sps:$4 sm:$0xff]   ;;  %v3301_v46 = vld [vmem:[#allocation8 + $0x10] ss:$8 sps:$4 sm:$0xff]  }
  0xb8   : > { %v3299_v43 = vld [vmem:[#allocation8 + $0x104] ss:$8 sps:$4 sm:$0xff]   ;;  %v3306_v47 = vld [vmem:[#allocation8 + $0x110] ss:$8 sps:$4 sm:$0xff]   ;;  %v3308_v48 = vld [vmem:[#allocation8 + $0x114] ss:$8 sps:$4 sm:$0xff]  }
  0xb9   : > { %v3312_v49 = vld [vmem:[#allocation8 + $0x24] ss:$8 sps:$4 sm:$0xff]   ;;  %v3310_v50 = vld [vmem:[#allocation8 + $0x20] ss:$8 sps:$4 sm:$0xff]   ;;  %v3265_v54 = vld [vmem:[%s4150_s11 + $0x34] ss:$8 sps:$4 sm:$0xff]  }
  0xba   : > { %832 = vmatpush1.bf16.msra.mxu0 %v3230_v18  ;;  %1025 = vmatpush1.bf16.msra.mxu1 %v3231_v19  ;;  %v3264_v51 = vld [vmem:[%s4150_s11 + $0x20] ss:$8 sps:$4 sm:$0xff]   ;;  %v3315_v52 = vld [vmem:[#allocation8 + $0x120] ss:$8 sps:$4 sm:$0xff]   ;;  %v3319_v56 = vld [vmem:[#allocation8 + $0x30] ss:$8 sps:$4 sm:$0xff]  }
  0xbb   : > { %833 = vmatprep.subr.bf16.mxu0 %v3232_v20  ;;  %1026 = vmatprep.subr.bf16.mxu1 %v3234_v21  ;;  %v3317_v53 = vld [vmem:[#allocation8 + $0x124] ss:$8 sps:$4 sm:$0xff]   ;;  %v3321_v55 = vld [vmem:[#allocation8 + $0x34] ss:$8 sps:$4 sm:$0xff]   ;;  %v3324_v57 = vld [vmem:[#allocation8 + $0x130] ss:$8 sps:$4 sm:$0xff]  }
  0xbc   : > { %v3326_v58 = vld [vmem:[#allocation8 + $0x134] ss:$8 sps:$4 sm:$0xff]   ;;  %v3328_v59 = vld [vmem:[#allocation8 + $0x40] ss:$8 sps:$4 sm:$0xff]   ;;  %v3330_v60 = vld [vmem:[#allocation8 + $0x44] ss:$8 sps:$4 sm:$0xff]  }
  0xbd   : > { %v3331_v61 = vld [vmem:[#allocation8 + $0x140] ss:$8 sps:$4 sm:$0xff]   ;;  %v3333_v62 = vld [vmem:[#allocation8 + $0x144] ss:$8 sps:$4 sm:$0xff]   ;;  %v3336_v1 = vld [vmem:[#allocation8 + $0x54] ss:$8 sps:$4 sm:$0xff]  }
  0xbe   : > { %834 = vmatpush1.bf16.msra.mxu0 %v3236_v22  ;;  %1027 = vmatpush1.bf16.msra.mxu1 %v3237_v23  ;;  %v3267_v63 = vld [vmem:[%s4150_s11 + $0x30] ss:$8 sps:$4 sm:$0xff]   ;;  %v3268_v0 = vld [vmem:[%s4150_s11 + $0x44] ss:$8 sps:$4 sm:$0xff]   ;;  %v3334_v3 = vld [vmem:[#allocation8 + $0x50] ss:$8 sps:$4 sm:$0xff]  }
  0xbf   : > { %835 = vmatprep.subr.bf16.mxu0 %v3238_v24  ;;  %1028 = vmatprep.subr.bf16.mxu1 %v3240_v25  ;;  %v3339_v2 = vld [vmem:[#allocation8 + $0x154] ss:$8 sps:$4 sm:$0xff]   ;;  %v3337_v4 = vld [vmem:[#allocation8 + $0x150] ss:$8 sps:$4 sm:$0xff]   ;;  %v3342_v5 = vld [vmem:[#allocation8 + $0x64] ss:$8 sps:$4 sm:$0xff]  }
  0xc0   : > { %v3345_v6 = vld [vmem:[#allocation8 + $0x164] ss:$8 sps:$4 sm:$0xff]   ;;  %v3340_v7 = vld [vmem:[#allocation8 + $0x60] ss:$8 sps:$4 sm:$0xff]   ;;  %v3271_v10 = vld [vmem:[%s4150_s11 + $0x54] ss:$8 sps:$4 sm:$0xff]  }
  0xc1   : > { %v3343_v8 = vld [vmem:[#allocation8 + $0x160] ss:$8 sps:$4 sm:$0xff]   ;;  %v3270_v9 = vld [vmem:[%s4150_s11 + $0x40] ss:$8 sps:$4 sm:$0xff]   ;;  %v3346_v13 = vld [vmem:[#allocation8 + $0x70] ss:$8 sps:$4 sm:$0xff]  }
  0xc2   : > { %836 = vmatpush1.bf16.msra.mxu0 %v3242_v26  ;;  %1029 = vmatpush1.bf16.msra.mxu1 %v3243_v27  ;;  %v3348_v11 = vld [vmem:[#allocation8 + $0x74] ss:$8 sps:$4 sm:$0xff]   ;;  %v3349_v14 = vld [vmem:[#allocation8 + $0x170] ss:$8 sps:$4 sm:$0xff]   ;;  %v3354_v15 = vld [vmem:[#allocation8 + $0x84] ss:$8 sps:$4 sm:$0xff]  }
  0xc3   : > { %837 = vmatprep.subr.bf16.mxu0 %v3244_v28  ;;  %1030 = vmatprep.subr.bf16.mxu1 %v3246_v29  ;;  %v3351_v12 = vld [vmem:[#allocation8 + $0x174] ss:$8 sps:$4 sm:$0xff]   ;;  %v3357_v16 = vld [vmem:[#allocation8 + $0x184] ss:$8 sps:$4 sm:$0xff]   ;;  %v3352_v17 = vld [vmem:[#allocation8 + $0x80] ss:$8 sps:$4 sm:$0xff]  }
  0xc4   : > { %v3355_v18 = vld [vmem:[#allocation8 + $0x180] ss:$8 sps:$4 sm:$0xff]   ;;  %v3273_v19 = vld [vmem:[%s4150_s11 + $0x50] ss:$8 sps:$4 sm:$0xff]   ;;  %v3358_v23 = vld [vmem:[#allocation8 + $0x90] ss:$8 sps:$4 sm:$0xff]  }
  0xc5   : > { %v3274_v20 = vld [vmem:[%s4150_s11 + $0x64] ss:$8 sps:$4 sm:$0xff]   ;;  %v3360_v21 = vld [vmem:[#allocation8 + $0x94] ss:$8 sps:$4 sm:$0xff]   ;;  %v3361_v24 = vld [vmem:[#allocation8 + $0x190] ss:$8 sps:$4 sm:$0xff]  }
  0xc6   : > { %838 = vmatpush1.bf16.msra.mxu0 %v3248_v31  ;;  %1031 = vmatpush1.bf16.msra.mxu1 %v3249_v32  ;;  %v3363_v22 = vld [vmem:[#allocation8 + $0x194] ss:$8 sps:$4 sm:$0xff]   ;;  %v3366_v25 = vld [vmem:[#allocation8 + $0xa4] ss:$8 sps:$4 sm:$0xff]   ;;  %v3364_v27 = vld [vmem:[#allocation8 + $0xa0] ss:$8 sps:$4 sm:$0xff]  }
  0xc7   : > { %839 = vmatprep.subr.bf16.mxu0 %v3250_v33  ;;  %1032 = vmatprep.subr.bf16.mxu1 %v3252_v34  ;;  %v3369_v26 = vld [vmem:[#allocation8 + $0x1a4] ss:$8 sps:$4 sm:$0xff]   ;;  %v3367_v28 = vld [vmem:[#allocation8 + $0x1a0] ss:$8 sps:$4 sm:$0xff]   ;;  %v3277_v30 = vld [vmem:[%s4150_s11 + $0x74] ss:$8 sps:$4 sm:$0xff]  }
  0xc8   : > { %v3276_v29 = vld [vmem:[%s4150_s11 + $0x60] ss:$8 sps:$4 sm:$0xff]   ;;  %v3370_v31 = vld [vmem:[#allocation8 + $0xb0] ss:$8 sps:$4 sm:$0xff]   ;;  %s4430_s7 = scalar_lea.vmem [#allocation12], %s4146_s28  ;;  %s2958_s9 = sshll.u32 %s3848_s24, 12 }
  0xc9   : > { %v3372_v32 = vld [vmem:[#allocation8 + $0xb4] ss:$8 sps:$4 sm:$0xff]   ;;  %v3373_v33 = vld [vmem:[#allocation8 + $0x1b0] ss:$8 sps:$4 sm:$0xff]   ;;  %s2588_s8 = sshll.u32 %s4387_s29, 4  ;;  %s4610_s17 = scalar_lea.hbm %s4727_s5, %s2958_s9  ;;  %s4613_s8 = int_to_ptr.vmem [resolvable:$true] %s2588_s8 }
  0xca   : > { %840 = vmatpush1.bf16.msra.mxu0 %v3254_v35  ;;  %1033 = vmatpush1.bf16.msra.mxu1 %v3255_v36  ;;  %v3375_v34 = vld [vmem:[#allocation8 + $0x1b4] ss:$8 sps:$4 sm:$0xff]   ;;  %v3378_v35 = vld [vmem:[#allocation8 + $0xc4] ss:$8 sps:$4 sm:$0xff]   ;;  %s2568_s1 = scalar_lea.sflag [#allocation4], %s4143_s16  ;;  %s3734_s13 = scalar_lea.vmem %s4613_s8, 4096 }
  0xcb   : > { %1797 = vmatprep.subr.bf16.mxu1 %v3294_v40  ;;  %1990 = vmatprep.subr.bf16.mxu0 %v3299_v43  ;;  %v3381_v36 = vld [vmem:[#allocation8 + $0x1c4] ss:$8 sps:$4 sm:$0xff]   ;;  %v3280_v40 = vld [vmem:[%s4150_s11 + $0x84] ss:$8 sps:$4 sm:$0xff]   ;;  %v3382_v43 = vld [vmem:[#allocation8 + $0xd0] ss:$8 sps:$4 sm:$0xff]   ;;  %p3735_p10 = scmp.ne.s32.totalorder %s4613_s8, %s3734_s13 }
  0xcc   : > { %s3867_s27 = smov [#allocation11]  }
  0xcd   : > { %856 = vmatmul.mubr.bf16.vlgmr.msra.gmra.mrb[0].mxu0 %v3256_v37  ;;  %1049 = vmatmul.mubr.bf16.vlgmr.msra.gmra.mrb[0].mxu1 %v3256_v37  ;;  %v3376_v37 = vld [vmem:[#allocation8 + $0xc0] ss:$8 sps:$4 sm:$0xff]   ;;  %p3736_p3 = pnand %p3735_p10, %p4085_p5  ;;  %s3738_s30 = sshll.u32 %s3867_s27, 4  ;;  %s3739_s30 = int_to_ptr.vmem [resolvable:$false] %s3738_s30 }
  0xce   : > { %2854 = vmatprep.mubr.msk.bf16.mxu0 %vm774_vm0, %v3259_v38  ;;  %2870 = vmatprep.mubr.msk.bf16.mxu1 %vm774_vm0, %v3259_v38  ;;  %v3379_v38 = vld [vmem:[#allocation8 + $0x1c0] ss:$8 sps:$4 sm:$0xff]   ;;  %s3740_s18 = scalar_lea.vmem %s3739_s30, 8192  ;;  %p3741_p8 = scmp.lt.s32.totalorder %s4613_s8, %s3739_s30 }
  0xcf   : > { %1798 = vmatpush1.bf16.msra.mxu1 %v3292_v39  ;;  %1991 = vmatpush1.bf16.msra.mxu0 %v3297_v42  ;;  %v3279_v39 = vld [vmem:[%s4150_s11 + $0x70] ss:$8 sps:$4 sm:$0xff]   ;;  %p3737_p2 = pneg %p3736_p3  ;;  %p3742_p7 = scmp.lt.s32.totalorder %s3740_s18, %s3734_s13 }
  0xd0   : > { %1799 = vmatprep.subr.bf16.mxu1 %v3303_v45  ;;  %1992 = vmatprep.subr.bf16.mxu0 %v3308_v48  ;;  %v3387_v42 = vld [vmem:[#allocation8 + $0x1d4] ss:$8 sps:$4 sm:$0xff]   ;;  %v3390_v45 = vld [vmem:[#allocation8 + $0xe4] ss:$8 sps:$4 sm:$0xff]   ;;  %v3391_v48 = vld [vmem:[#allocation8 + $0x1e0] ss:$8 sps:$4 sm:$0xff]  }
  0xd1   : > { %p3743_p9 = por %p3742_p7, %p3741_p8 }
  0xd3   : > { %1800 = vmatpush1.bf16.msra.mxu1 %v3301_v46  ;;  %1993 = vmatpush1.bf16.msra.mxu0 %v3306_v47  ;;  %v3393_v46 = vld [vmem:[#allocation8 + $0x1e4] ss:$8 sps:$4 sm:$0xff]   ;;  %v3388_v47 = vld [vmem:[#allocation8 + $0xe0] ss:$8 sps:$4 sm:$0xff]   ;;  %p3744_p0 = pnand %p3743_p9, %p3737_p2 }
  0xd4   : > { %1801 = vmatprep.subr.bf16.mxu1 %v3312_v49  ;;  %1994 = vmatprep.subr.bf16.mxu0 %v3317_v53  ;;  %v3282_v49 = vld [vmem:[%s4150_s11 + $0x80] ss:$8 sps:$4 sm:$0xff]  }
  0xd5   : > { %866 = vmatmul.mubr.bf16.gmra.mrb[4].mxu0 %v3261_v41  ;;  %1059 = vmatmul.mubr.bf16.gmra.mrb[4].mxu1 %v3261_v41  ;;  %v3384_v41 = vld [vmem:[#allocation8 + $0xd4] ss:$8 sps:$4 sm:$0xff]  }
  0xd6   : > { %2855 = vmatprep.mubr.msk.bf16.mxu0 %vm774_vm0, %v3262_v44  ;;  %2871 = vmatprep.mubr.msk.bf16.mxu1 %vm774_vm0, %v3262_v44  ;;  %v3385_v44 = vld [vmem:[#allocation8 + $0x1d0] ss:$8 sps:$4 sm:$0xff]   ;;  %v3288_v53 = vld [vmem:[%s4150_s11 + $0xa0] ss:$8 sps:$4 sm:$0xff]  }
  0xd7   : > { %1802 = vmatpush1.bf16.msra.mxu1 %v3310_v50  ;;  %1995 = vmatpush1.bf16.msra.mxu0 %v3315_v52  ;;  %v3283_v50 = vld [vmem:[%s4150_s11 + $0x94] ss:$8 sps:$4 sm:$0xff]   ;;  %v3286_v52 = vld [vmem:[%s4150_s11 + $0xa4] ss:$8 sps:$4 sm:$0xff]  }
  0xd8   : > { %1803 = vmatprep.subr.bf16.mxu1 %v3321_v55  ;;  %1996 = vmatprep.subr.bf16.mxu0 %v3326_v58  ;;  %v3291_v55 = vld [vmem:[%s4150_s11 + $0xb0] ss:$8 sps:$4 sm:$0xff]  }
  0xd9   : > { %v3399_v58 = vld [vmem:[#allocation8 + $0x1f4] ss:$8 sps:$4 sm:$0xff]  }
  0xdb   : > { %1804 = vmatpush1.bf16.msra.mxu1 %v3319_v56  ;;  %1997 = vmatpush1.bf16.msra.mxu0 %v3324_v57  ;;  %v3295_v56 = vld [vmem:[%s4150_s11 + $0xc4] ss:$8 sps:$4 sm:$0xff]   ;;  %v3396_v57 = vld [vmem:[#allocation8 + $0xf4] ss:$8 sps:$4 sm:$0xff]  }
  0xdc   : > { %1805 = vmatprep.subr.bf16.mxu1 %v3330_v60  ;;  %1998 = vmatprep.subr.bf16.mxu0 %v3333_v62  ;;  %v3397_v60 = vld [vmem:[#allocation8 + $0x1f0] ss:$8 sps:$4 sm:$0xff]  }
  0xdd   : > { %876 = vmatmul.mubr.bf16.gmra.mrb[8].mxu0 %v3264_v51  ;;  %1069 = vmatmul.mubr.bf16.gmra.mrb[8].mxu1 %v3264_v51  ;;  %v3285_v51 = vld [vmem:[%s4150_s11 + $0x90] ss:$8 sps:$4 sm:$0xff]   ;;  %v3304_v62 = vld [vmem:[%s4150_s11 + $0xd4] ss:$8 sps:$4 sm:$0xff]  }
  0xde   : > { %2856 = vmatprep.mubr.msk.bf16.mxu0 %vm774_vm0, %v3265_v54  ;;  %2872 = vmatprep.mubr.msk.bf16.mxu1 %vm774_vm0, %v3265_v54  ;;  %v3289_v54 = vld [vmem:[%s4150_s11 + $0xb4] ss:$8 sps:$4 sm:$0xff]  }
  0xdf   : > { %1806 = vmatpush1.bf16.msra.mxu1 %v3328_v59  ;;  %1999 = vmatpush1.bf16.msra.mxu0 %v3331_v61  ;;  %v3394_v59 = vld [vmem:[#allocation8 + $0xf0] ss:$8 sps:$4 sm:$0xff]   ;;  %v3300_v61 = vld [vmem:[%s4150_s11 + $0xc0] ss:$8 sps:$4 sm:$0xff]  }
  0xe0   : > { %1807 = vmatprep.subr.bf16.mxu1 %v3336_v1  ;;  %2000 = vmatprep.subr.bf16.mxu0 %v3339_v2  ;;  %v3318_v1 = vld [vmem:[%s4150_s11 + $0xe0] ss:$8 sps:$4 sm:$0xff]   ;;  %v3322_v2 = vld [vmem:[%s4150_s11 + $0xf4] ss:$8 sps:$4 sm:$0xff]  }
  0xe3   : > { %1808 = vmatpush1.bf16.msra.mxu1 %v3334_v3  ;;  %2001 = vmatpush1.bf16.msra.mxu0 %v3337_v4  ;;  %v3327_v3 = vld [vmem:[%s4150_s11 + $0xf0] ss:$8 sps:$4 sm:$0xff]   ;;  %v430_v4 = vlaneseq }
  0xe4   : > { %1809 = vmatprep.subr.bf16.mxu1 %v3342_v5  ;;  %2002 = vmatprep.subr.bf16.mxu0 %v3345_v6 }
  0xe5   : > { %886 = vmatmul.mubr.bf16.gmra.mrb[12].mxu0 %v3267_v63  ;;  %1079 = vmatmul.mubr.bf16.gmra.mrb[12].mxu1 %v3267_v63  ;;  %v3309_v63 = vld [vmem:[%s4150_s11 + $0xd0] ss:$8 sps:$4 sm:$0xff]   ;;  %v4228_v5 = vshrl.u32 %v430_v4, 7 }
  0xe6   : > { %2857 = vmatprep.mubr.msk.bf16.mxu0 %vm774_vm0, %v3268_v0  ;;  %2873 = vmatprep.mubr.msk.bf16.mxu1 %vm774_vm0, %v3268_v0  ;;  %v3313_v0 = vld [vmem:[%s4150_s11 + $0xe4] ss:$8 sps:$4 sm:$0xff]  }
  0xe7   : > { %1810 = vmatpush1.bf16.msra.mxu1 %v3340_v7  ;;  %2003 = vmatpush1.bf16.msra.mxu0 %v3343_v8  ;;  %v432_v6 = vsub.s32 0, %v4228_v5  ;;  %v440_v7 = vsub.s32 2, %v4228_v5  ;;  %v428_v8 = vld [vmem:[#allocation7] sm:$0xf] }
  0xe8   : > { %1811 = vmatprep.subr.bf16.mxu1 %v3348_v11  ;;  %2004 = vmatprep.subr.bf16.mxu0 %v3351_v12 }
  0xe9   : > { %v4236_v11 = vrot.slane %v428_v8, %v432_v6  ;;  %v4238_v12 = vrot.slane %v428_v8, %v440_v7 }
  0xeb   : > { %1812 = vmatpush1.bf16.msra.mxu1 %v3346_v13  ;;  %2005 = vmatpush1.bf16.msra.mxu0 %v3349_v14 }
  0xec   : > { %1813 = vmatprep.subr.bf16.mxu1 %v3354_v15  ;;  %2006 = vmatprep.subr.bf16.mxu0 %v3357_v16 }
  0xed   : > { %896 = vmatmul.mubr.bf16.gmra.mrb[16].mxu0 %v3270_v9  ;;  %1089 = vmatmul.mubr.bf16.gmra.mrb[16].mxu1 %v3270_v9  ;;  %v436_v9 = vsub.s32 1, %v4228_v5 }
  0xee   : > { %2858 = vmatprep.mubr.msk.bf16.mxu0 %vm774_vm0, %v3271_v10  ;;  %2874 = vmatprep.mubr.msk.bf16.mxu1 %vm774_vm0, %v3271_v10  ;;  %v444_v10 = vsub.s32 3, %v4228_v5 }
  0xef   : > { %1814 = vmatpush1.bf16.msra.mxu1 %v3352_v17  ;;  %2007 = vmatpush1.bf16.msra.mxu0 %v3355_v18  ;;  %v4242_v13 = vrot.slane %v428_v8, %v436_v9 }
  0xf0   : > { %1815 = vmatprep.subr.bf16.mxu1 %v3360_v21  ;;  %2008 = vmatprep.subr.bf16.mxu0 %v3363_v22  ;;  %v4244_v14 = vrot.slane %v428_v8, %v444_v10 }
  0xf3   : > { %1816 = vmatpush1.bf16.msra.mxu1 %v3358_v23  ;;  %2009 = vmatpush1.bf16.msra.mxu0 %v3361_v24 }
  0xf4   : > { %1817 = vmatprep.subr.bf16.mxu1 %v3366_v25  ;;  %2010 = vmatprep.subr.bf16.mxu0 %v3369_v26 }
  0xf5   : > { %906 = vmatmul.mubr.bf16.gmra.mrb[20].mxu0 %v3273_v19  ;;  %1099 = vmatmul.mubr.bf16.gmra.mrb[20].mxu1 %v3273_v19 }
  0xf6   : > { %2859 = vmatprep.mubr.msk.bf16.mxu0 %vm774_vm0, %v3274_v20  ;;  %2875 = vmatprep.mubr.msk.bf16.mxu1 %vm774_vm0, %v3274_v20 }
  0xf7   : > { %1818 = vmatpush1.bf16.msra.mxu1 %v3364_v27  ;;  %2011 = vmatpush1.bf16.msra.mxu0 %v3367_v28 }
  0xf8   : > { %1819 = vmatprep.subr.bf16.mxu1 %v3372_v32  ;;  %2012 = vmatprep.subr.bf16.mxu0 %v3375_v34 }
  0xfb   : > { %1820 = vmatpush1.bf16.msra.mxu1 %v3370_v31  ;;  %2013 = vmatpush1.bf16.msra.mxu0 %v3373_v33 }
  0xfc   : > { %1821 = vmatprep.subr.bf16.mxu1 %v3378_v35  ;;  %2014 = vmatprep.subr.bf16.mxu0 %v3381_v36 }
  0xfd   : > { %916 = vmatmul.mubr.bf16.gmra.mrb[24].mxu0 %v3276_v29  ;;  %1109 = vmatmul.mubr.bf16.gmra.mrb[24].mxu1 %v3276_v29 }
  0xfe   : > { %2860 = vmatprep.mubr.msk.bf16.mxu0 %vm774_vm0, %v3277_v30  ;;  %2876 = vmatprep.mubr.msk.bf16.mxu1 %vm774_vm0, %v3277_v30 }
  0xff   : > { %1822 = vmatpush1.bf16.msra.mxu1 %v3376_v37  ;;  %2015 = vmatpush1.bf16.msra.mxu0 %v3379_v38 }
 0x100   : > { %1823 = vmatprep.subr.bf16.mxu1 %v3384_v41  ;;  %2016 = vmatprep.subr.bf16.mxu0 %v3387_v42 }
 0x103   : > { %1824 = vmatpush1.bf16.msra.mxu1 %v3382_v43  ;;  %2017 = vmatpush1.bf16.msra.mxu0 %v3385_v44 }
 0x104   : > { %1825 = vmatprep.subr.bf16.mxu1 %v3390_v45  ;;  %2018 = vmatprep.subr.bf16.mxu0 %v3393_v46 }
 0x105   : > { %926 = vmatmul.mubr.bf16.gmra.mrb[28].mxu0 %v3279_v39  ;;  %1119 = vmatmul.mubr.bf16.gmra.mrb[28].mxu1 %v3279_v39 }
 0x106   : > { %2861 = vmatprep.mubr.msk.bf16.mxu0 %vm774_vm0, %v3280_v40  ;;  %2877 = vmatprep.mubr.msk.bf16.mxu1 %vm774_vm0, %v3280_v40 }
 0x107   : > { %1826 = vmatpush1.bf16.msra.mxu1 %v3388_v47  ;;  %2019 = vmatpush1.bf16.msra.mxu0 %v3391_v48 }
 0x108   : > { %1827 = vmatprep.subr.bf16.mxu1 %v3396_v57  ;;  %2020 = vmatprep.subr.bf16.mxu0 %v3399_v58 }
 0x10b   : > { %1828 = vmatpush1.bf16.msra.mxu1 %v3394_v59  ;;  %2021 = vmatpush1.bf16.msra.mxu0 %v3397_v60 }
 0x10d   : > { %936 = vmatmul.mubr.bf16.gmra.mrb[32].mxu0 %v3282_v49  ;;  %1129 = vmatmul.mubr.bf16.gmra.mrb[32].mxu1 %v3282_v49 }
 0x10e   : > { %2862 = vmatprep.mubr.msk.bf16.mxu0 %vm774_vm0, %v3283_v50  ;;  %2878 = vmatprep.mubr.msk.bf16.mxu1 %vm774_vm0, %v3283_v50 }
 0x115   : > { %946 = vmatmul.mubr.bf16.gmra.mrb[36].mxu0 %v3285_v51  ;;  %1139 = vmatmul.mubr.bf16.gmra.mrb[36].mxu1 %v3285_v51 }
 0x116   : > { %2863 = vmatprep.mubr.msk.bf16.mxu0 %vm774_vm0, %v3286_v52  ;;  %2879 = vmatprep.mubr.msk.bf16.mxu1 %vm774_vm0, %v3286_v52 }
 0x11d   : > { %956 = vmatmul.mubr.bf16.gmra.mrb[40].mxu0 %v3288_v53  ;;  %1149 = vmatmul.mubr.bf16.gmra.mrb[40].mxu1 %v3288_v53 }
 0x11e   : > { %2864 = vmatprep.mubr.msk.bf16.mxu0 %vm774_vm0, %v3289_v54  ;;  %2880 = vmatprep.mubr.msk.bf16.mxu1 %vm774_vm0, %v3289_v54 }
 0x125   : > { %966 = vmatmul.mubr.bf16.gmra.mrb[44].mxu0 %v3291_v55  ;;  %1159 = vmatmul.mubr.bf16.gmra.mrb[44].mxu1 %v3291_v55 }
 0x126   : > { %2865 = vmatprep.mubr.msk.bf16.mxu0 %vm774_vm0, %v3295_v56  ;;  %2881 = vmatprep.mubr.msk.bf16.mxu1 %vm774_vm0, %v3295_v56 }
 0x12d   : > { %976 = vmatmul.mubr.bf16.gmra.mrb[48].mxu0 %v3300_v61  ;;  %1169 = vmatmul.mubr.bf16.gmra.mrb[48].mxu1 %v3300_v61 }
 0x12e   : > { %2866 = vmatprep.mubr.msk.bf16.mxu0 %vm774_vm0, %v3304_v62  ;;  %2882 = vmatprep.mubr.msk.bf16.mxu1 %vm774_vm0, %v3304_v62 }
 0x135   : > { %986 = vmatmul.mubr.bf16.gmra.mrb[52].mxu0 %v3309_v63  ;;  %1179 = vmatmul.mubr.bf16.gmra.mrb[52].mxu1 %v3309_v63 }
 0x136   : > { %2867 = vmatprep.mubr.msk.bf16.mxu0 %vm774_vm0, %v3313_v0  ;;  %2883 = vmatprep.mubr.msk.bf16.mxu1 %vm774_vm0, %v3313_v0 }
 0x13d   : > { %996 = vmatmul.mubr.bf16.gmra.mrb[56].mxu0 %v3318_v1  ;;  %1189 = vmatmul.mubr.bf16.gmra.mrb[56].mxu1 %v3318_v1 }
 0x13e   : > { %2868 = vmatprep.mubr.msk.bf16.mxu0 %vm774_vm0, %v3322_v2  ;;  %2884 = vmatprep.mubr.msk.bf16.mxu1 %vm774_vm0, %v3322_v2 }
 0x145   : > { %1006 = vmatmul.mubr.bf16.gmra.mrb[60].mxu0 %v3327_v3  ;;  %1199 = vmatmul.mubr.bf16.gmra.mrb[60].mxu1 %v3327_v3 }
 0x1a0   : > { %v857_v15 = vpop.f32.mrb[0].mxu0  ;;  %v1050_v16 = vpop.f32.mrb[0].mxu1 }
 0x1a1   : > { %v858_v17 = vadd.f32 %v857_v15, %v4236_v11  ;;  %v1051_v18 = vadd.f32 %v1050_v16, %v4238_v12  ;;  %v859_v19 = vpop.f32.mrb[1].mxu0  ;;  %v1052_v20 = vpop.f32.mrb[1].mxu1 }
 0x1a2   : > { %v860_v21 = vadd.f32 %v859_v19, %v4242_v13  ;;  %v1053_v22 = vadd.f32 %v1052_v20, %v4244_v14  ;;  %v861_v23 = vpop.f32.mrb[2].mxu0  ;;  %v1054_v24 = vpop.f32.mrb[2].mxu1 }
 0x1a3   : > { %v1211_v25 = vmax.f32 %v1051_v18, 0.0  ;;  %v862_v26 = vadd.f32 %v861_v23, %v4236_v11  ;;  %v1055_v27 = vadd.f32 %v1054_v24, %v4238_v12  ;;  %v863_v28 = vpop.f32.mrb[3].mxu0  ;;  %v1056_v29 = vpop.f32.mrb[3].mxu1  ;;  %v1209_v33 = vmax.f32 %v858_v17, 0.0 }
 0x1a4   : > { %v1212_v30 = vmax.f32 %v1053_v22, 0.0  ;;  %v864_v31 = vadd.f32 %v863_v28, %v4242_v13  ;;  %v1057_v32 = vadd.f32 %v1056_v29, %v4244_v14  ;;  %v1210_v36 = vmax.f32 %v860_v21, 0.0 }
 0x1a5   : > { %v1213_v34 = vmax.f32 %v862_v26, 0.0  ;;  %v1215_v35 = vmax.f32 %v1055_v27, 0.0 }
 0x1a6   : > { %v1214_v37 = vmax.f32 %v864_v31, 0.0  ;;  %v1216_v38 = vmax.f32 %v1057_v32, 0.0 }
 0x1a7   : > { %v1337_v39 = vpack.c.bf16 %v1213_v34, %v1209_v33  ;;  %v1339_v40 = vpack.c.bf16 %v1215_v35, %v1211_v25 }
 0x1a8   : > { %v1338_v41 = vpack.c.bf16 %v1214_v37, %v1210_v36  ;;  %v1340_v42 = vpack.c.bf16 %v1216_v38, %v1212_v30  ;;  %v867_v43 = vpop.f32.mrb[4].mxu0  ;;  %v1060_v44 = vpop.f32.mrb[4].mxu1 }
 0x1a9   : > { %v868_v45 = vadd.f32 %v867_v43, %v4236_v11  ;;  %v1061_v46 = vadd.f32 %v1060_v44, %v4238_v12  ;;  %v869_v47 = vpop.f32.mrb[5].mxu0  ;;  %v1062_v48 = vpop.f32.mrb[5].mxu1 }
 0x1aa   : > { %v870_v49 = vadd.f32 %v869_v47, %v4242_v13  ;;  %v1063_v50 = vadd.f32 %v1062_v48, %v4244_v14  ;;  %v871_v51 = vpop.f32.mrb[6].mxu0  ;;  %v1064_v52 = vpop.f32.mrb[6].mxu1  ;;  %1829 = vmatprep.mubr.bf16.mxu1 %v1338_v41  ;;  %2022 = vmatprep.mubr.bf16.mxu0 %v1340_v42 }
 0x1ab   : > { %v1219_v53 = vmax.f32 %v1061_v46, 0.0  ;;  %v872_v54 = vadd.f32 %v871_v51, %v4236_v11  ;;  %v1065_v55 = vadd.f32 %v1064_v52, %v4238_v12  ;;  %v873_v56 = vpop.f32.mrb[7].mxu0  ;;  %v1066_v57 = vpop.f32.mrb[7].mxu1  ;;  %1830 = vmatmul.mubr.bf16.vlgmr.msra.gmra.mrb[64].mxu1 %v1337_v39  ;;  %2023 = vmatmul.mubr.bf16.vlgmr.msra.gmra.mrb[64].mxu0 %v1339_v40  ;;  %v1217_v61 = vmax.f32 %v868_v45, 0.0 }
 0x1ac   : > { %v1220_v58 = vmax.f32 %v1063_v50, 0.0  ;;  %v874_v59 = vadd.f32 %v873_v56, %v4242_v13  ;;  %v1067_v60 = vadd.f32 %v1066_v57, %v4244_v14  ;;  %v1218_v0 = vmax.f32 %v870_v49, 0.0 }
 0x1ad   : > { %v1221_v62 = vmax.f32 %v872_v54, 0.0  ;;  %v1223_v63 = vmax.f32 %v1065_v55, 0.0 }
 0x1ae   : > { %v1222_v1 = vmax.f32 %v874_v59, 0.0  ;;  %v1224_v2 = vmax.f32 %v1067_v60, 0.0 }
 0x1af   : > { %v1341_v3 = vpack.c.bf16 %v1221_v62, %v1217_v61  ;;  %v1343_v4 = vpack.c.bf16 %v1223_v63, %v1219_v53 }
 0x1b0   : > { %v1342_v7 = vpack.c.bf16 %v1222_v1, %v1218_v0  ;;  %v1344_v8 = vpack.c.bf16 %v1224_v2, %v1220_v58  ;;  %v877_v10 = vpop.f32.mrb[8].mxu0  ;;  %v1070_v15 = vpop.f32.mrb[8].mxu1 }
 0x1b1   : > { %v878_v16 = vadd.f32 %v877_v10, %v4236_v11  ;;  %v1071_v17 = vadd.f32 %v1070_v15, %v4238_v12  ;;  %v879_v18 = vpop.f32.mrb[9].mxu0  ;;  %v1072_v19 = vpop.f32.mrb[9].mxu1 }
 0x1b2   : > { %v880_v20 = vadd.f32 %v879_v18, %v4242_v13  ;;  %v1073_v21 = vadd.f32 %v1072_v19, %v4244_v14  ;;  %v881_v22 = vpop.f32.mrb[10].mxu0  ;;  %v1074_v23 = vpop.f32.mrb[10].mxu1  ;;  %1839 = vmatprep.mubr.bf16.mxu1 %v1342_v7  ;;  %2032 = vmatprep.mubr.bf16.mxu0 %v1344_v8 }
 0x1b3   : > { %v1227_v24 = vmax.f32 %v1071_v17, 0.0  ;;  %v882_v25 = vadd.f32 %v881_v22, %v4236_v11  ;;  %v1075_v26 = vadd.f32 %v1074_v23, %v4238_v12  ;;  %v883_v27 = vpop.f32.mrb[11].mxu0  ;;  %v1076_v28 = vpop.f32.mrb[11].mxu1  ;;  %1840 = vmatmul.mubr.bf16.gmra.mrb[68].mxu1 %v1341_v3  ;;  %2033 = vmatmul.mubr.bf16.gmra.mrb[68].mxu0 %v1343_v4  ;;  %v1225_v32 = vmax.f32 %v878_v16, 0.0 }
 0x1b4   : > { %v1228_v29 = vmax.f32 %v1073_v21, 0.0  ;;  %v884_v30 = vadd.f32 %v883_v27, %v4242_v13  ;;  %v1077_v31 = vadd.f32 %v1076_v28, %v4244_v14  ;;  %v1226_v35 = vmax.f32 %v880_v20, 0.0 }
 0x1b5   : > { %v1229_v33 = vmax.f32 %v882_v25, 0.0  ;;  %v1231_v34 = vmax.f32 %v1075_v26, 0.0 }
 0x1b6   : > { %v1230_v36 = vmax.f32 %v884_v30, 0.0  ;;  %v1232_v37 = vmax.f32 %v1077_v31, 0.0 }
 0x1b7   : > { %v1345_v38 = vpack.c.bf16 %v1229_v33, %v1225_v32  ;;  %v1347_v39 = vpack.c.bf16 %v1231_v34, %v1227_v24 }
 0x1b8   : > { %v1346_v40 = vpack.c.bf16 %v1230_v36, %v1226_v35  ;;  %v1348_v41 = vpack.c.bf16 %v1232_v37, %v1228_v29  ;;  %v887_v42 = vpop.f32.mrb[12].mxu0  ;;  %v1080_v43 = vpop.f32.mrb[12].mxu1 }
 0x1b9   : > { %v888_v44 = vadd.f32 %v887_v42, %v4236_v11  ;;  %v1081_v45 = vadd.f32 %v1080_v43, %v4238_v12  ;;  %v889_v46 = vpop.f32.mrb[13].mxu0  ;;  %v1082_v47 = vpop.f32.mrb[13].mxu1 }
 0x1ba   : > { %v890_v48 = vadd.f32 %v889_v46, %v4242_v13  ;;  %v1083_v49 = vadd.f32 %v1082_v47, %v4244_v14  ;;  %v891_v50 = vpop.f32.mrb[14].mxu0  ;;  %v1084_v51 = vpop.f32.mrb[14].mxu1  ;;  %1849 = vmatprep.mubr.bf16.mxu1 %v1346_v40  ;;  %2042 = vmatprep.mubr.bf16.mxu0 %v1348_v41 }
 0x1bb   : > { %v1235_v52 = vmax.f32 %v1081_v45, 0.0  ;;  %v892_v53 = vadd.f32 %v891_v50, %v4236_v11  ;;  %v1085_v54 = vadd.f32 %v1084_v51, %v4238_v12  ;;  %v893_v55 = vpop.f32.mrb[15].mxu0  ;;  %v1086_v56 = vpop.f32.mrb[15].mxu1  ;;  %1850 = vmatmul.mubr.bf16.gmra.mrb[72].mxu1 %v1345_v38  ;;  %2043 = vmatmul.mubr.bf16.gmra.mrb[72].mxu0 %v1347_v39  ;;  %v1233_v60 = vmax.f32 %v888_v44, 0.0 }
 0x1bc   : > { %v1236_v57 = vmax.f32 %v1083_v49, 0.0  ;;  %v894_v58 = vadd.f32 %v893_v55, %v4242_v13  ;;  %v1087_v59 = vadd.f32 %v1086_v56, %v4244_v14  ;;  %v1234_v63 = vmax.f32 %v890_v48, 0.0 }
 0x1bd   : > { %v1237_v61 = vmax.f32 %v892_v53, 0.0  ;;  %v1239_v62 = vmax.f32 %v1085_v54, 0.0 }
 0x1be   : > { %v1238_v0 = vmax.f32 %v894_v58, 0.0  ;;  %v1240_v1 = vmax.f32 %v1087_v59, 0.0 }
 0x1bf   : > { %v1349_v2 = vpack.c.bf16 %v1237_v61, %v1233_v60  ;;  %v1351_v3 = vpack.c.bf16 %v1239_v62, %v1235_v52 }
 0x1c0   : > { %v1350_v4 = vpack.c.bf16 %v1238_v0, %v1234_v63  ;;  %v1352_v7 = vpack.c.bf16 %v1240_v1, %v1236_v57  ;;  %v897_v8 = vpop.f32.mrb[16].mxu0  ;;  %v1090_v10 = vpop.f32.mrb[16].mxu1 }
 0x1c1   : > { %v898_v15 = vadd.f32 %v897_v8, %v4236_v11  ;;  %v1091_v16 = vadd.f32 %v1090_v10, %v4238_v12  ;;  %v899_v17 = vpop.f32.mrb[17].mxu0  ;;  %v1092_v18 = vpop.f32.mrb[17].mxu1 }
 0x1c2   : > { %v900_v19 = vadd.f32 %v899_v17, %v4242_v13  ;;  %v1093_v20 = vadd.f32 %v1092_v18, %v4244_v14  ;;  %v901_v21 = vpop.f32.mrb[18].mxu0  ;;  %v1094_v22 = vpop.f32.mrb[18].mxu1  ;;  %1859 = vmatprep.mubr.bf16.mxu1 %v1350_v4  ;;  %2052 = vmatprep.mubr.bf16.mxu0 %v1352_v7 }
 0x1c3   : > { %v1243_v23 = vmax.f32 %v1091_v16, 0.0  ;;  %v902_v24 = vadd.f32 %v901_v21, %v4236_v11  ;;  %v1095_v25 = vadd.f32 %v1094_v22, %v4238_v12  ;;  %v903_v26 = vpop.f32.mrb[19].mxu0  ;;  %v1096_v27 = vpop.f32.mrb[19].mxu1  ;;  %1860 = vmatmul.mubr.bf16.gmra.mrb[76].mxu1 %v1349_v2  ;;  %2053 = vmatmul.mubr.bf16.gmra.mrb[76].mxu0 %v1351_v3  ;;  %v1241_v31 = vmax.f32 %v898_v15, 0.0 }
 0x1c4   : > { %v1244_v28 = vmax.f32 %v1093_v20, 0.0  ;;  %v904_v29 = vadd.f32 %v903_v26, %v4242_v13  ;;  %v1097_v30 = vadd.f32 %v1096_v27, %v4244_v14  ;;  %v1242_v34 = vmax.f32 %v900_v19, 0.0 }
 0x1c5   : > { %v1245_v32 = vmax.f32 %v902_v24, 0.0  ;;  %v1247_v33 = vmax.f32 %v1095_v25, 0.0 }
 0x1c6   : > { %v1246_v35 = vmax.f32 %v904_v29, 0.0  ;;  %v1248_v36 = vmax.f32 %v1097_v30, 0.0 }
 0x1c7   : > { %v1353_v37 = vpack.c.bf16 %v1245_v32, %v1241_v31  ;;  %v1355_v38 = vpack.c.bf16 %v1247_v33, %v1243_v23 }
 0x1c8   : > { %v1354_v39 = vpack.c.bf16 %v1246_v35, %v1242_v34  ;;  %v1356_v40 = vpack.c.bf16 %v1248_v36, %v1244_v28  ;;  %v907_v41 = vpop.f32.mrb[20].mxu0  ;;  %v1100_v42 = vpop.f32.mrb[20].mxu1 }
 0x1c9   : > { %v908_v43 = vadd.f32 %v907_v41, %v4236_v11  ;;  %v1101_v44 = vadd.f32 %v1100_v42, %v4238_v12  ;;  %v909_v45 = vpop.f32.mrb[21].mxu0  ;;  %v1102_v46 = vpop.f32.mrb[21].mxu1 }
 0x1ca   : > { %v910_v47 = vadd.f32 %v909_v45, %v4242_v13  ;;  %v1103_v48 = vadd.f32 %v1102_v46, %v4244_v14  ;;  %v911_v49 = vpop.f32.mrb[22].mxu0  ;;  %v1104_v50 = vpop.f32.mrb[22].mxu1  ;;  %1869 = vmatprep.mubr.bf16.mxu1 %v1354_v39  ;;  %2062 = vmatprep.mubr.bf16.mxu0 %v1356_v40 }
 0x1cb   : > { %v1251_v51 = vmax.f32 %v1101_v44, 0.0  ;;  %v912_v52 = vadd.f32 %v911_v49, %v4236_v11  ;;  %v1105_v53 = vadd.f32 %v1104_v50, %v4238_v12  ;;  %v913_v54 = vpop.f32.mrb[23].mxu0  ;;  %v1106_v55 = vpop.f32.mrb[23].mxu1  ;;  %1870 = vmatmul.mubr.bf16.gmra.mrb[80].mxu1 %v1353_v37  ;;  %2063 = vmatmul.mubr.bf16.gmra.mrb[80].mxu0 %v1355_v38  ;;  %v1249_v59 = vmax.f32 %v908_v43, 0.0 }
 0x1cc   : > { %v1252_v56 = vmax.f32 %v1103_v48, 0.0  ;;  %v914_v57 = vadd.f32 %v913_v54, %v4242_v13  ;;  %v1107_v58 = vadd.f32 %v1106_v55, %v4244_v14  ;;  %v1250_v62 = vmax.f32 %v910_v47, 0.0 }
 0x1cd   : > { %v1253_v60 = vmax.f32 %v912_v52, 0.0  ;;  %v1255_v61 = vmax.f32 %v1105_v53, 0.0 }
 0x1ce   : > { %v1254_v63 = vmax.f32 %v914_v57, 0.0  ;;  %v1256_v0 = vmax.f32 %v1107_v58, 0.0 }
 0x1cf   : > { %v1357_v1 = vpack.c.bf16 %v1253_v60, %v1249_v59  ;;  %v1359_v2 = vpack.c.bf16 %v1255_v61, %v1251_v51 }
 0x1d0   : > { %v1358_v3 = vpack.c.bf16 %v1254_v63, %v1250_v62  ;;  %v1360_v4 = vpack.c.bf16 %v1256_v0, %v1252_v56  ;;  %v917_v7 = vpop.f32.mrb[24].mxu0  ;;  %v1110_v8 = vpop.f32.mrb[24].mxu1 }
 0x1d1   : > { %v918_v10 = vadd.f32 %v917_v7, %v4236_v11  ;;  %v1111_v15 = vadd.f32 %v1110_v8, %v4238_v12  ;;  %v919_v16 = vpop.f32.mrb[25].mxu0  ;;  %v1112_v17 = vpop.f32.mrb[25].mxu1 }
 0x1d2   : > { %v920_v18 = vadd.f32 %v919_v16, %v4242_v13  ;;  %v1113_v19 = vadd.f32 %v1112_v17, %v4244_v14  ;;  %v921_v20 = vpop.f32.mrb[26].mxu0  ;;  %v1114_v21 = vpop.f32.mrb[26].mxu1  ;;  %1879 = vmatprep.mubr.bf16.mxu1 %v1358_v3  ;;  %2072 = vmatprep.mubr.bf16.mxu0 %v1360_v4 }
 0x1d3   : > { %v1259_v22 = vmax.f32 %v1111_v15, 0.0  ;;  %v922_v23 = vadd.f32 %v921_v20, %v4236_v11  ;;  %v1115_v24 = vadd.f32 %v1114_v21, %v4238_v12  ;;  %v923_v25 = vpop.f32.mrb[27].mxu0  ;;  %v1116_v26 = vpop.f32.mrb[27].mxu1  ;;  %1880 = vmatmul.mubr.bf16.gmra.mrb[84].mxu1 %v1357_v1  ;;  %2073 = vmatmul.mubr.bf16.gmra.mrb[84].mxu0 %v1359_v2  ;;  %v1257_v30 = vmax.f32 %v918_v10, 0.0 }
 0x1d4   : > { %v1260_v27 = vmax.f32 %v1113_v19, 0.0  ;;  %v924_v28 = vadd.f32 %v923_v25, %v4242_v13  ;;  %v1117_v29 = vadd.f32 %v1116_v26, %v4244_v14  ;;  %v1258_v33 = vmax.f32 %v920_v18, 0.0 }
 0x1d5   : > { %v1261_v31 = vmax.f32 %v922_v23, 0.0  ;;  %v1263_v32 = vmax.f32 %v1115_v24, 0.0 }
 0x1d6   : > { %v1262_v34 = vmax.f32 %v924_v28, 0.0  ;;  %v1264_v35 = vmax.f32 %v1117_v29, 0.0 }
 0x1d7   : > { %v1361_v36 = vpack.c.bf16 %v1261_v31, %v1257_v30  ;;  %v1363_v37 = vpack.c.bf16 %v1263_v32, %v1259_v22 }
 0x1d8   : > { %v1362_v38 = vpack.c.bf16 %v1262_v34, %v1258_v33  ;;  %v1364_v39 = vpack.c.bf16 %v1264_v35, %v1260_v27  ;;  %v927_v40 = vpop.f32.mrb[28].mxu0  ;;  %v1120_v41 = vpop.f32.mrb[28].mxu1 }
 0x1d9   : > { %v928_v42 = vadd.f32 %v927_v40, %v4236_v11  ;;  %v1121_v43 = vadd.f32 %v1120_v41, %v4238_v12  ;;  %v929_v44 = vpop.f32.mrb[29].mxu0  ;;  %v1122_v45 = vpop.f32.mrb[29].mxu1 }
 0x1da   : > { %v930_v46 = vadd.f32 %v929_v44, %v4242_v13  ;;  %v1123_v47 = vadd.f32 %v1122_v45, %v4244_v14  ;;  %v931_v48 = vpop.f32.mrb[30].mxu0  ;;  %v1124_v49 = vpop.f32.mrb[30].mxu1  ;;  %1889 = vmatprep.mubr.bf16.mxu1 %v1362_v38  ;;  %2082 = vmatprep.mubr.bf16.mxu0 %v1364_v39 }
 0x1db   : > { %v1267_v50 = vmax.f32 %v1121_v43, 0.0  ;;  %v932_v51 = vadd.f32 %v931_v48, %v4236_v11  ;;  %v1125_v52 = vadd.f32 %v1124_v49, %v4238_v12  ;;  %v933_v53 = vpop.f32.mrb[31].mxu0  ;;  %v1126_v54 = vpop.f32.mrb[31].mxu1  ;;  %1890 = vmatmul.mubr.bf16.gmra.mrb[88].mxu1 %v1361_v36  ;;  %2083 = vmatmul.mubr.bf16.gmra.mrb[88].mxu0 %v1363_v37  ;;  %v1265_v58 = vmax.f32 %v928_v42, 0.0 }
 0x1dc   : > { %v1268_v55 = vmax.f32 %v1123_v47, 0.0  ;;  %v934_v56 = vadd.f32 %v933_v53, %v4242_v13  ;;  %v1127_v57 = vadd.f32 %v1126_v54, %v4244_v14  ;;  %v1266_v61 = vmax.f32 %v930_v46, 0.0 }
 0x1dd   : > { %v1269_v59 = vmax.f32 %v932_v51, 0.0  ;;  %v1271_v60 = vmax.f32 %v1125_v52, 0.0 }
 0x1de   : > { %v1270_v62 = vmax.f32 %v934_v56, 0.0  ;;  %v1272_v63 = vmax.f32 %v1127_v57, 0.0 }
 0x1df   : > { %v1365_v0 = vpack.c.bf16 %v1269_v59, %v1265_v58  ;;  %v1367_v1 = vpack.c.bf16 %v1271_v60, %v1267_v50 }
 0x1e0   : > { %v1366_v2 = vpack.c.bf16 %v1270_v62, %v1266_v61  ;;  %v1368_v3 = vpack.c.bf16 %v1272_v63, %v1268_v55  ;;  %v937_v4 = vpop.f32.mrb[32].mxu0  ;;  %v1130_v7 = vpop.f32.mrb[32].mxu1 }
 0x1e1   : > { %v938_v8 = vadd.f32 %v937_v4, %v4236_v11  ;;  %v1131_v10 = vadd.f32 %v1130_v7, %v4238_v12  ;;  %v939_v15 = vpop.f32.mrb[33].mxu0  ;;  %v1132_v16 = vpop.f32.mrb[33].mxu1 }
 0x1e2   : > { %v940_v17 = vadd.f32 %v939_v15, %v4242_v13  ;;  %v1133_v18 = vadd.f32 %v1132_v16, %v4244_v14  ;;  %v941_v19 = vpop.f32.mrb[34].mxu0  ;;  %v1134_v20 = vpop.f32.mrb[34].mxu1  ;;  %1899 = vmatprep.mubr.bf16.mxu1 %v1366_v2  ;;  %2092 = vmatprep.mubr.bf16.mxu0 %v1368_v3 }
 0x1e3   : > { %v1275_v21 = vmax.f32 %v1131_v10, 0.0  ;;  %v942_v22 = vadd.f32 %v941_v19, %v4236_v11  ;;  %v1135_v23 = vadd.f32 %v1134_v20, %v4238_v12  ;;  %v943_v24 = vpop.f32.mrb[35].mxu0  ;;  %v1136_v25 = vpop.f32.mrb[35].mxu1  ;;  %1900 = vmatmul.mubr.bf16.gmra.mrb[92].mxu1 %v1365_v0  ;;  %2093 = vmatmul.mubr.bf16.gmra.mrb[92].mxu0 %v1367_v1  ;;  %v1273_v29 = vmax.f32 %v938_v8, 0.0 }
 0x1e4   : > { %v1276_v26 = vmax.f32 %v1133_v18, 0.0  ;;  %v944_v27 = vadd.f32 %v943_v24, %v4242_v13  ;;  %v1137_v28 = vadd.f32 %v1136_v25, %v4244_v14  ;;  %v1274_v32 = vmax.f32 %v940_v17, 0.0 }
 0x1e5   : > { %v1277_v30 = vmax.f32 %v942_v22, 0.0  ;;  %v1279_v31 = vmax.f32 %v1135_v23, 0.0 }
 0x1e6   : > { %v1278_v33 = vmax.f32 %v944_v27, 0.0  ;;  %v1280_v34 = vmax.f32 %v1137_v28, 0.0 }
 0x1e7   : > { %v1369_v35 = vpack.c.bf16 %v1277_v30, %v1273_v29  ;;  %v1371_v36 = vpack.c.bf16 %v1279_v31, %v1275_v21 }
 0x1e8   : > { %v1370_v37 = vpack.c.bf16 %v1278_v33, %v1274_v32  ;;  %v1372_v38 = vpack.c.bf16 %v1280_v34, %v1276_v26  ;;  %v947_v39 = vpop.f32.mrb[36].mxu0  ;;  %v1140_v40 = vpop.f32.mrb[36].mxu1 }
 0x1e9   : > { %v948_v41 = vadd.f32 %v947_v39, %v4236_v11  ;;  %v1141_v42 = vadd.f32 %v1140_v40, %v4238_v12  ;;  %v949_v43 = vpop.f32.mrb[37].mxu0  ;;  %v1142_v44 = vpop.f32.mrb[37].mxu1 }
 0x1ea   : > { %v950_v45 = vadd.f32 %v949_v43, %v4242_v13  ;;  %v1143_v46 = vadd.f32 %v1142_v44, %v4244_v14  ;;  %v951_v47 = vpop.f32.mrb[38].mxu0  ;;  %v1144_v48 = vpop.f32.mrb[38].mxu1  ;;  %1909 = vmatprep.mubr.bf16.mxu1 %v1370_v37  ;;  %2102 = vmatprep.mubr.bf16.mxu0 %v1372_v38 }
 0x1eb   : > { %v1283_v49 = vmax.f32 %v1141_v42, 0.0  ;;  %v952_v50 = vadd.f32 %v951_v47, %v4236_v11  ;;  %v1145_v51 = vadd.f32 %v1144_v48, %v4238_v12  ;;  %v953_v52 = vpop.f32.mrb[39].mxu0  ;;  %v1146_v53 = vpop.f32.mrb[39].mxu1  ;;  %1910 = vmatmul.mubr.bf16.gmra.mrb[96].mxu1 %v1369_v35  ;;  %2103 = vmatmul.mubr.bf16.gmra.mrb[96].mxu0 %v1371_v36  ;;  %v1281_v57 = vmax.f32 %v948_v41, 0.0 }
 0x1ec   : > { %v1284_v54 = vmax.f32 %v1143_v46, 0.0  ;;  %v954_v55 = vadd.f32 %v953_v52, %v4242_v13  ;;  %v1147_v56 = vadd.f32 %v1146_v53, %v4244_v14  ;;  %v1282_v60 = vmax.f32 %v950_v45, 0.0 }
 0x1ed   : > { %v1285_v58 = vmax.f32 %v952_v50, 0.0  ;;  %v1287_v59 = vmax.f32 %v1145_v51, 0.0 }
 0x1ee   : > { %v1286_v61 = vmax.f32 %v954_v55, 0.0  ;;  %v1288_v62 = vmax.f32 %v1147_v56, 0.0 }
 0x1ef   : > { %v1373_v63 = vpack.c.bf16 %v1285_v58, %v1281_v57  ;;  %v1375_v0 = vpack.c.bf16 %v1287_v59, %v1283_v49 }
 0x1f0   : > { %v1374_v1 = vpack.c.bf16 %v1286_v61, %v1282_v60  ;;  %v1376_v2 = vpack.c.bf16 %v1288_v62, %v1284_v54  ;;  %v957_v3 = vpop.f32.mrb[40].mxu0  ;;  %v1150_v4 = vpop.f32.mrb[40].mxu1 }
 0x1f1   : > { %v958_v7 = vadd.f32 %v957_v3, %v4236_v11  ;;  %v1151_v8 = vadd.f32 %v1150_v4, %v4238_v12  ;;  %v959_v10 = vpop.f32.mrb[41].mxu0  ;;  %v1152_v15 = vpop.f32.mrb[41].mxu1 }
 0x1f2   : > { %v960_v16 = vadd.f32 %v959_v10, %v4242_v13  ;;  %v1153_v17 = vadd.f32 %v1152_v15, %v4244_v14  ;;  %v961_v18 = vpop.f32.mrb[42].mxu0  ;;  %v1154_v19 = vpop.f32.mrb[42].mxu1  ;;  %1919 = vmatprep.mubr.bf16.mxu1 %v1374_v1  ;;  %2112 = vmatprep.mubr.bf16.mxu0 %v1376_v2 }
 0x1f3   : > { %v1291_v20 = vmax.f32 %v1151_v8, 0.0  ;;  %v962_v21 = vadd.f32 %v961_v18, %v4236_v11  ;;  %v1155_v22 = vadd.f32 %v1154_v19, %v4238_v12  ;;  %v963_v23 = vpop.f32.mrb[43].mxu0  ;;  %v1156_v24 = vpop.f32.mrb[43].mxu1  ;;  %1920 = vmatmul.mubr.bf16.gmra.mrb[100].mxu1 %v1373_v63  ;;  %2113 = vmatmul.mubr.bf16.gmra.mrb[100].mxu0 %v1375_v0  ;;  %v1289_v28 = vmax.f32 %v958_v7, 0.0 }
 0x1f4   : > { %v1292_v25 = vmax.f32 %v1153_v17, 0.0  ;;  %v964_v26 = vadd.f32 %v963_v23, %v4242_v13  ;;  %v1157_v27 = vadd.f32 %v1156_v24, %v4244_v14  ;;  %v1290_v31 = vmax.f32 %v960_v16, 0.0 }
 0x1f5   : > { %v1293_v29 = vmax.f32 %v962_v21, 0.0  ;;  %v1295_v30 = vmax.f32 %v1155_v22, 0.0 }
 0x1f6   : > { %v1294_v32 = vmax.f32 %v964_v26, 0.0  ;;  %v1296_v33 = vmax.f32 %v1157_v27, 0.0 }
 0x1f7   : > { %v1377_v34 = vpack.c.bf16 %v1293_v29, %v1289_v28  ;;  %v1379_v35 = vpack.c.bf16 %v1295_v30, %v1291_v20 }
 0x1f8   : > { %v1378_v36 = vpack.c.bf16 %v1294_v32, %v1290_v31  ;;  %v1380_v37 = vpack.c.bf16 %v1296_v33, %v1292_v25  ;;  %v967_v38 = vpop.f32.mrb[44].mxu0  ;;  %v1160_v39 = vpop.f32.mrb[44].mxu1 }
 0x1f9   : > { %v968_v40 = vadd.f32 %v967_v38, %v4236_v11  ;;  %v1161_v41 = vadd.f32 %v1160_v39, %v4238_v12  ;;  %v969_v42 = vpop.f32.mrb[45].mxu0  ;;  %v1162_v43 = vpop.f32.mrb[45].mxu1 }
 0x1fa   : > { %v970_v44 = vadd.f32 %v969_v42, %v4242_v13  ;;  %v1163_v45 = vadd.f32 %v1162_v43, %v4244_v14  ;;  %v971_v46 = vpop.f32.mrb[46].mxu0  ;;  %v1164_v47 = vpop.f32.mrb[46].mxu1  ;;  %1929 = vmatprep.mubr.bf16.mxu1 %v1378_v36  ;;  %2122 = vmatprep.mubr.bf16.mxu0 %v1380_v37 }
 0x1fb   : > { %v1299_v48 = vmax.f32 %v1161_v41, 0.0  ;;  %v972_v49 = vadd.f32 %v971_v46, %v4236_v11  ;;  %v1165_v50 = vadd.f32 %v1164_v47, %v4238_v12  ;;  %v973_v51 = vpop.f32.mrb[47].mxu0  ;;  %v1166_v52 = vpop.f32.mrb[47].mxu1  ;;  %1930 = vmatmul.mubr.bf16.gmra.mrb[104].mxu1 %v1377_v34  ;;  %2123 = vmatmul.mubr.bf16.gmra.mrb[104].mxu0 %v1379_v35  ;;  %v1297_v56 = vmax.f32 %v968_v40, 0.0 }
 0x1fc   : > { %v1300_v53 = vmax.f32 %v1163_v45, 0.0  ;;  %v974_v54 = vadd.f32 %v973_v51, %v4242_v13  ;;  %v1167_v55 = vadd.f32 %v1166_v52, %v4244_v14  ;;  %v1298_v59 = vmax.f32 %v970_v44, 0.0 }
 0x1fd   : > { %v1301_v57 = vmax.f32 %v972_v49, 0.0  ;;  %v1303_v58 = vmax.f32 %v1165_v50, 0.0 }
 0x1fe   : > { %v1302_v60 = vmax.f32 %v974_v54, 0.0  ;;  %v1304_v61 = vmax.f32 %v1167_v55, 0.0 }
 0x1ff   : > { %v1381_v62 = vpack.c.bf16 %v1301_v57, %v1297_v56  ;;  %v1383_v63 = vpack.c.bf16 %v1303_v58, %v1299_v48 }
 0x200   : > { %v1382_v0 = vpack.c.bf16 %v1302_v60, %v1298_v59  ;;  %v1384_v1 = vpack.c.bf16 %v1304_v61, %v1300_v53  ;;  %v977_v2 = vpop.f32.mrb[48].mxu0  ;;  %v1170_v3 = vpop.f32.mrb[48].mxu1 }
 0x201   : > { %v978_v4 = vadd.f32 %v977_v2, %v4236_v11  ;;  %v1171_v7 = vadd.f32 %v1170_v3, %v4238_v12  ;;  %v979_v8 = vpop.f32.mrb[49].mxu0  ;;  %v1172_v10 = vpop.f32.mrb[49].mxu1 }
 0x202   : > { %v980_v15 = vadd.f32 %v979_v8, %v4242_v13  ;;  %v1173_v16 = vadd.f32 %v1172_v10, %v4244_v14  ;;  %v981_v17 = vpop.f32.mrb[50].mxu0  ;;  %v1174_v18 = vpop.f32.mrb[50].mxu1  ;;  %1939 = vmatprep.mubr.bf16.mxu1 %v1382_v0  ;;  %2132 = vmatprep.mubr.bf16.mxu0 %v1384_v1 }
 0x203   : > { %v1307_v19 = vmax.f32 %v1171_v7, 0.0  ;;  %v982_v20 = vadd.f32 %v981_v17, %v4236_v11  ;;  %v1175_v21 = vadd.f32 %v1174_v18, %v4238_v12  ;;  %v983_v22 = vpop.f32.mrb[51].mxu0  ;;  %v1176_v23 = vpop.f32.mrb[51].mxu1  ;;  %1940 = vmatmul.mubr.bf16.gmra.mrb[108].mxu1 %v1381_v62  ;;  %2133 = vmatmul.mubr.bf16.gmra.mrb[108].mxu0 %v1383_v63  ;;  %v1305_v27 = vmax.f32 %v978_v4, 0.0 }
 0x204   : > { %v1308_v24 = vmax.f32 %v1173_v16, 0.0  ;;  %v984_v25 = vadd.f32 %v983_v22, %v4242_v13  ;;  %v1177_v26 = vadd.f32 %v1176_v23, %v4244_v14  ;;  %v1306_v30 = vmax.f32 %v980_v15, 0.0 }
 0x205   : > { %v1309_v28 = vmax.f32 %v982_v20, 0.0  ;;  %v1311_v29 = vmax.f32 %v1175_v21, 0.0 }
 0x206   : > { %v1310_v31 = vmax.f32 %v984_v25, 0.0  ;;  %v1312_v32 = vmax.f32 %v1177_v26, 0.0 }
 0x207   : > { %v1385_v33 = vpack.c.bf16 %v1309_v28, %v1305_v27  ;;  %v1387_v34 = vpack.c.bf16 %v1311_v29, %v1307_v19 }
 0x208   : > { %v1386_v35 = vpack.c.bf16 %v1310_v31, %v1306_v30  ;;  %v1388_v36 = vpack.c.bf16 %v1312_v32, %v1308_v24  ;;  %v987_v37 = vpop.f32.mrb[52].mxu0  ;;  %v1180_v38 = vpop.f32.mrb[52].mxu1 }
 0x209   : > { %v988_v39 = vadd.f32 %v987_v37, %v4236_v11  ;;  %v1181_v40 = vadd.f32 %v1180_v38, %v4238_v12  ;;  %v989_v41 = vpop.f32.mrb[53].mxu0  ;;  %v1182_v42 = vpop.f32.mrb[53].mxu1 }
 0x20a   : > { %v990_v43 = vadd.f32 %v989_v41, %v4242_v13  ;;  %v1183_v44 = vadd.f32 %v1182_v42, %v4244_v14  ;;  %v991_v45 = vpop.f32.mrb[54].mxu0  ;;  %v1184_v46 = vpop.f32.mrb[54].mxu1  ;;  %1949 = vmatprep.mubr.bf16.mxu1 %v1386_v35  ;;  %2142 = vmatprep.mubr.bf16.mxu0 %v1388_v36 }
 0x20b   : > { %v1315_v47 = vmax.f32 %v1181_v40, 0.0  ;;  %v992_v48 = vadd.f32 %v991_v45, %v4236_v11  ;;  %v1185_v49 = vadd.f32 %v1184_v46, %v4238_v12  ;;  %v993_v50 = vpop.f32.mrb[55].mxu0  ;;  %v1186_v51 = vpop.f32.mrb[55].mxu1  ;;  %1950 = vmatmul.mubr.bf16.gmra.mrb[112].mxu1 %v1385_v33  ;;  %2143 = vmatmul.mubr.bf16.gmra.mrb[112].mxu0 %v1387_v34  ;;  %v1313_v55 = vmax.f32 %v988_v39, 0.0 }
 0x20c   : > { %v1316_v52 = vmax.f32 %v1183_v44, 0.0  ;;  %v994_v53 = vadd.f32 %v993_v50, %v4242_v13  ;;  %v1187_v54 = vadd.f32 %v1186_v51, %v4244_v14  ;;  %v1314_v58 = vmax.f32 %v990_v43, 0.0 }
 0x20d   : > { %v1317_v56 = vmax.f32 %v992_v48, 0.0  ;;  %v1319_v57 = vmax.f32 %v1185_v49, 0.0 }
 0x20e   : > { %v1318_v59 = vmax.f32 %v994_v53, 0.0  ;;  %v1320_v60 = vmax.f32 %v1187_v54, 0.0 }
 0x20f   : > { %v1389_v61 = vpack.c.bf16 %v1317_v56, %v1313_v55  ;;  %v1391_v62 = vpack.c.bf16 %v1319_v57, %v1315_v47 }
 0x210   : > { %v1390_v63 = vpack.c.bf16 %v1318_v59, %v1314_v58  ;;  %v1392_v0 = vpack.c.bf16 %v1320_v60, %v1316_v52  ;;  %v997_v1 = vpop.f32.mrb[56].mxu0  ;;  %v1190_v2 = vpop.f32.mrb[56].mxu1 }
 0x211   : > { %v998_v3 = vadd.f32 %v997_v1, %v4236_v11  ;;  %v1191_v4 = vadd.f32 %v1190_v2, %v4238_v12  ;;  %v999_v7 = vpop.f32.mrb[57].mxu0  ;;  %v1192_v8 = vpop.f32.mrb[57].mxu1 }
 0x212   : > { %v1000_v10 = vadd.f32 %v999_v7, %v4242_v13  ;;  %v1193_v15 = vadd.f32 %v1192_v8, %v4244_v14  ;;  %v1001_v16 = vpop.f32.mrb[58].mxu0  ;;  %v1194_v17 = vpop.f32.mrb[58].mxu1  ;;  %1959 = vmatprep.mubr.bf16.mxu1 %v1390_v63  ;;  %2152 = vmatprep.mubr.bf16.mxu0 %v1392_v0 }
 0x213   : > { %v1323_v18 = vmax.f32 %v1191_v4, 0.0  ;;  %v1002_v19 = vadd.f32 %v1001_v16, %v4236_v11  ;;  %v1195_v20 = vadd.f32 %v1194_v17, %v4238_v12  ;;  %v1003_v21 = vpop.f32.mrb[59].mxu0  ;;  %v1196_v22 = vpop.f32.mrb[59].mxu1  ;;  %1960 = vmatmul.mubr.bf16.gmra.mrb[116].mxu1 %v1389_v61  ;;  %2153 = vmatmul.mubr.bf16.gmra.mrb[116].mxu0 %v1391_v62  ;;  %v1321_v26 = vmax.f32 %v998_v3, 0.0 }
 0x214   : > { %v1324_v23 = vmax.f32 %v1193_v15, 0.0  ;;  %v1004_v24 = vadd.f32 %v1003_v21, %v4242_v13  ;;  %v1197_v25 = vadd.f32 %v1196_v22, %v4244_v14  ;;  %v1322_v29 = vmax.f32 %v1000_v10, 0.0 }
 0x215   : > { %v1325_v27 = vmax.f32 %v1002_v19, 0.0  ;;  %v1327_v28 = vmax.f32 %v1195_v20, 0.0 }
 0x216   : > { %v1326_v30 = vmax.f32 %v1004_v24, 0.0  ;;  %v1328_v31 = vmax.f32 %v1197_v25, 0.0 }
 0x217   : > { %v1393_v32 = vpack.c.bf16 %v1325_v27, %v1321_v26  ;;  %v1395_v33 = vpack.c.bf16 %v1327_v28, %v1323_v18 }
 0x218   : > { %v1394_v34 = vpack.c.bf16 %v1326_v30, %v1322_v29  ;;  %v1396_v35 = vpack.c.bf16 %v1328_v31, %v1324_v23  ;;  %v1007_v36 = vpop.f32.mrb[60].mxu0  ;;  %v1200_v37 = vpop.f32.mrb[60].mxu1 }
 0x219   : > { %v1008_v38 = vadd.f32 %v1007_v36, %v4236_v11  ;;  %v1201_v39 = vadd.f32 %v1200_v37, %v4238_v12  ;;  %v1009_v40 = vpop.f32.mrb[61].mxu0  ;;  %v1202_v41 = vpop.f32.mrb[61].mxu1 }
 0x21a   : > { %v1010_v42 = vadd.f32 %v1009_v40, %v4242_v13  ;;  %v1203_v43 = vadd.f32 %v1202_v41, %v4244_v14  ;;  %v1011_v44 = vpop.f32.mrb[62].mxu0  ;;  %v1204_v45 = vpop.f32.mrb[62].mxu1  ;;  %1969 = vmatprep.mubr.bf16.mxu1 %v1394_v34  ;;  %2162 = vmatprep.mubr.bf16.mxu0 %v1396_v35 }
 0x21b   : > { %v1331_v46 = vmax.f32 %v1201_v39, 0.0  ;;  %v1012_v47 = vadd.f32 %v1011_v44, %v4236_v11  ;;  %v1205_v48 = vadd.f32 %v1204_v45, %v4238_v12  ;;  %v1013_v49 = vpop.f32.mrb[63].mxu0  ;;  %v1206_v50 = vpop.f32.mrb[63].mxu1  ;;  %1970 = vmatmul.mubr.bf16.gmra.mrb[120].mxu1 %v1393_v32  ;;  %2163 = vmatmul.mubr.bf16.gmra.mrb[120].mxu0 %v1395_v33  ;;  %v1329_v54 = vmax.f32 %v1008_v38, 0.0  ;;  %v1465_v12 = vld [vmem:[#allocation10] sm:$0x3] }
 0x21c   : > { %v1332_v51 = vmax.f32 %v1203_v43, 0.0  ;;  %v1014_v52 = vadd.f32 %v1013_v49, %v4242_v13  ;;  %v1207_v53 = vadd.f32 %v1206_v50, %v4244_v14  ;;  %v1330_v57 = vmax.f32 %v1010_v42, 0.0 }
 0x21d   : > { %v1333_v55 = vmax.f32 %v1012_v47, 0.0  ;;  %v1335_v56 = vmax.f32 %v1205_v48, 0.0  ;;  %v4376_v13 = vrot.slane %v1465_v12, %v432_v6  ;;  %v4380_v14 = vrot.slane %v1465_v12, %v436_v9 }
 0x21e   : > { %v1334_v58 = vmax.f32 %v1014_v52, 0.0  ;;  %v1336_v59 = vmax.f32 %v1207_v53, 0.0 }
 0x21f   : > { %v1397_v60 = vpack.c.bf16 %v1333_v55, %v1329_v54  ;;  %v1399_v61 = vpack.c.bf16 %v1335_v56, %v1331_v46 }
 0x220   : > { %v1398_v11 = vpack.c.bf16 %v1334_v58, %v1330_v57  ;;  %v1400_v62 = vpack.c.bf16 %v1336_v59, %v1332_v51 }
 0x222   : > { %1979 = vmatprep.mubr.bf16.mxu1 %v1398_v11  ;;  %2172 = vmatprep.mubr.bf16.mxu0 %v1400_v62 }
 0x223   : > { %1980 = vmatmul.mubr.bf16.gmra.mrb[124].mxu1 %v1397_v60  ;;  %2173 = vmatmul.mubr.bf16.gmra.mrb[124].mxu0 %v1399_v61 }
 0x27e   : > { %v1831_v63 = vpop.f32.mrb[64].mxu1  ;;  %v2024_v0 = vpop.f32.mrb[64].mxu0 }
 0x27f   : > { %v1832_v1 = vadd.f32 %v1831_v63, %v4376_v13  ;;  %v1833_v2 = vpop.f32.mrb[65].mxu1  ;;  %v2026_v3 = vpop.f32.mrb[65].mxu0 }
 0x280   : > { %v1834_v4 = vadd.f32 %v1833_v2, %v4380_v14  ;;  %v1835_v7 = vpop.f32.mrb[66].mxu1  ;;  %v2028_v8 = vpop.f32.mrb[66].mxu0 }
 0x281   : > { %v2025_v10 = vadd.f32 %v2024_v0, %v1832_v1  ;;  %v1836_v15 = vadd.f32 %v1835_v7, %v4376_v13  ;;  %v1837_v6 = vpop.f32.mrb[67].mxu1  ;;  %v2030_v16 = vpop.f32.mrb[67].mxu0 }
 0x282   : > { %v2027_v17 = vadd.f32 %v2026_v3, %v1834_v4  ;;  %v1838_v5 = vadd.f32 %v1837_v6, %v4380_v14 }
 0x283   : > { %2183 = vst [vmem:[%s4387_s29] sm:$0xff] %v2025_v10  ;;  %v2029_v9 = vadd.f32 %v2028_v8, %v1836_v15 }
 0x284   : > { %v2215_v18 = vmax.f32 %v2025_v10, %v2027_v17  ;;  %v2031_v19 = vadd.f32 %v2030_v16, %v1838_v5 }
 0x285   : > { %2184 = vst [vmem:[%s4387_s29 + $0x8] sm:$0xff] %v2029_v9 }
 0x286   : > { %v2247_v20 = vsub.f32 %v2025_v10, %v2215_v18  ;;  %v2343_v21 = vsub.f32 %v2027_v17, %v2215_v18  ;;  %v2216_v22 = vmax.f32 %v2029_v9, %v2031_v19  ;;  %v1841_v23 = vpop.f32.mrb[68].mxu1  ;;  %v2034_v24 = vpop.f32.mrb[68].mxu0 }
 0x287   : > { %v1842_v25 = vadd.f32 %v1841_v23, %v4376_v13  ;;  %v1843_v26 = vpop.f32.mrb[69].mxu1  ;;  %v2036_v27 = vpop.f32.mrb[69].mxu0 }
 0x288   : > { %v2279_v28 = vmul.f32 1.442695, %v2247_v20  ;;  %v2375_v29 = vmul.f32 1.442695, %v2343_v21  ;;  %v2248_v30 = vsub.f32 %v2029_v9, %v2216_v22  ;;  %v2344_v31 = vsub.f32 %v2031_v19, %v2216_v22  ;;  %v1845_v32 = vpop.f32.mrb[70].mxu1  ;;  %v2038_v33 = vpop.f32.mrb[70].mxu0 }
 0x289   : > { %v2035_v34 = vadd.f32 %v2034_v24, %v1842_v25  ;;  %v1844_v35 = vadd.f32 %v1843_v26, %v4380_v14  ;;  %v1846_v36 = vadd.f32 %v1845_v32, %v4376_v13  ;;  %v1847_v37 = vpop.f32.mrb[71].mxu1  ;;  %v2040_v38 = vpop.f32.mrb[71].mxu0 }
 0x28a   : > { %3400 = vpow2.f32 %v2279_v28  ;;  %v2281_v39 = vmul.f32 1.442695, %v2248_v30  ;;  %v2377_v40 = vmul.f32 1.442695, %v2344_v31  ;;  %v1848_v41 = vadd.f32 %v1847_v37, %v4380_v14 }
 0x28b   : > { %3402 = vpow2.f32 %v2375_v29  ;;  %2185 = vst [vmem:[%s4387_s29 + $0x10] sm:$0xff] %v2035_v34  ;;  %v2037_v42 = vadd.f32 %v2036_v27, %v1844_v35  ;;  %v2039_v43 = vadd.f32 %v2038_v33, %v1846_v36 }
 0x28c   : > { %3404 = vpow2.f32 %v2281_v39  ;;  %v2041_v44 = vadd.f32 %v2040_v38, %v1848_v41 }
 0x28d   : > { %3406 = vpow2.f32 %v2377_v40  ;;  %v2217_v45 = vmax.f32 %v2035_v34, %v2037_v42  ;;  %2186 = vst [vmem:[%s4387_s29 + $0x18] sm:$0xff] %v2039_v43 }
 0x28e   : > { %v2218_v46 = vmax.f32 %v2039_v43, %v2041_v44  ;;  %v1851_v47 = vpop.f32.mrb[72].mxu1  ;;  %v2044_v48 = vpop.f32.mrb[72].mxu0 }
 0x28f   : > { %v2249_v49 = vsub.f32 %v2035_v34, %v2217_v45  ;;  %v2345_v50 = vsub.f32 %v2037_v42, %v2217_v45  ;;  %v1852_v51 = vadd.f32 %v1851_v47, %v4376_v13  ;;  %v1853_v52 = vpop.f32.mrb[73].mxu1  ;;  %v2046_v53 = vpop.f32.mrb[73].mxu0 }
 0x290   : > { %v2250_v54 = vsub.f32 %v2039_v43, %v2218_v46  ;;  %v2346_v55 = vsub.f32 %v2041_v44, %v2218_v46  ;;  %v1854_v56 = vadd.f32 %v1853_v52, %v4380_v14  ;;  %v1855_v57 = vpop.f32.mrb[74].mxu1  ;;  %v2048_v58 = vpop.f32.mrb[74].mxu0 }
 0x291   : > { %v2283_v59 = vmul.f32 1.442695, %v2249_v49  ;;  %v2379_v60 = vmul.f32 1.442695, %v2345_v50  ;;  %v2045_v61 = vadd.f32 %v2044_v48, %v1852_v51  ;;  %v1856_v11 = vadd.f32 %v1855_v57, %v4376_v13  ;;  %v1857_v62 = vpop.f32.mrb[75].mxu1  ;;  %v2050_v12 = vpop.f32.mrb[75].mxu0 }
 0x292   : > { %v2285_v63 = vmul.f32 1.442695, %v2250_v54  ;;  %v2381_v0 = vmul.f32 1.442695, %v2346_v55  ;;  %v2047_v1 = vadd.f32 %v2046_v53, %v1854_v56  ;;  %v1858_v2 = vadd.f32 %v1857_v62, %v4380_v14 }
 0x293   : > { %3408 = vpow2.f32 %v2283_v59  ;;  %2187 = vst [vmem:[%s4387_s29 + $0x20] sm:$0xff] %v2045_v61  ;;  %v2049_v3 = vadd.f32 %v2048_v58, %v1856_v11 }
 0x294   : > { %v4402_v4 = vpop.eup %3400  ;;  %3410 = vpow2.f32 %v2379_v60  ;;  %v2219_v7 = vmax.f32 %v2045_v61, %v2047_v1  ;;  %v2051_v8 = vadd.f32 %v2050_v12, %v1858_v2 }
 0x295   : > { %v3403_v10 = vpop.eup %3402  ;;  %3412 = vpow2.f32 %v2285_v63  ;;  %2188 = vst [vmem:[%s4387_s29 + $0x28] sm:$0xff] %v2049_v3 }
 0x296   : > { %v4405_v15 = vpop.eup %3404  ;;  %v2439_v6 = vadd.f32 %v3403_v10, %v4402_v4  ;;  %3414 = vpow2.f32 %v2381_v0  ;;  %v2251_v16 = vsub.f32 %v2045_v61, %v2219_v7  ;;  %v2347_v17 = vsub.f32 %v2047_v1, %v2219_v7  ;;  %v1861_v5 = vpop.f32.mrb[76].mxu1 }
 0x297   : > { %v2054_v9 = vpop.f32.mrb[76].mxu0  ;;  %v3407_v18 = vpop.eup %3406  ;;  %v2220_v19 = vmax.f32 %v2049_v3, %v2051_v8  ;;  %v1862_v20 = vadd.f32 %v1861_v5, %v4376_v13 }
 0x298   : > { %v1863_v21 = vpop.f32.mrb[77].mxu1  ;;  %v2056_v22 = vpop.f32.mrb[77].mxu0  ;;  %3416 = vrcp.f32 %v2439_v6  ;;  %v2440_v23 = vadd.f32 %v3407_v18, %v4405_v15  ;;  %v2287_v24 = vmul.f32 1.442695, %v2251_v16  ;;  %v2383_v25 = vmul.f32 1.442695, %v2347_v17 }
 0x299   : > { %v1865_v26 = vpop.f32.mrb[78].mxu1  ;;  %v2058_v27 = vpop.f32.mrb[78].mxu0  ;;  %v2252_v28 = vsub.f32 %v2049_v3, %v2220_v19  ;;  %v2348_v29 = vsub.f32 %v2051_v8, %v2220_v19  ;;  %v2055_v30 = vadd.f32 %v2054_v9, %v1862_v20  ;;  %v1864_v31 = vadd.f32 %v1863_v21, %v4380_v14 }
 0x29a   : > { %v1867_v32 = vpop.f32.mrb[79].mxu1  ;;  %v2060_v33 = vpop.f32.mrb[79].mxu0  ;;  %3418 = vrcp.f32 %v2440_v23  ;;  %v1866_v34 = vadd.f32 %v1865_v26, %v4376_v13 }
 0x29b   : > { %v1868_v35 = vadd.f32 %v1867_v32, %v4380_v14  ;;  %3420 = vpow2.f32 %v2287_v24  ;;  %v2289_v36 = vmul.f32 1.442695, %v2252_v28  ;;  %v2385_v37 = vmul.f32 1.442695, %v2348_v29  ;;  %2189 = vst [vmem:[%s4387_s29 + $0x30] sm:$0xff] %v2055_v30 }
 0x29c   : > { %v2057_v38 = vadd.f32 %v2056_v22, %v1864_v31  ;;  %3422 = vpow2.f32 %v2383_v25  ;;  %v2059_v39 = vadd.f32 %v2058_v27, %v1866_v34 }
 0x29d   : > { %v2061_v40 = vadd.f32 %v2060_v33, %v1868_v35  ;;  %v4414_v41 = vpop.eup %3408  ;;  %3424 = vpow2.f32 %v2289_v36 }
 0x29e   : > { %v2221_v42 = vmax.f32 %v2055_v30, %v2057_v38  ;;  %v3411_v43 = vpop.eup %3410  ;;  %3426 = vpow2.f32 %v2385_v37  ;;  %2190 = vst [vmem:[%s4387_s29 + $0x38] sm:$0xff] %v2059_v39  ;;  %v1871_v45 = vpop.f32.mrb[80].mxu1 }
 0x29f   : > { %v2222_v44 = vmax.f32 %v2059_v39, %v2061_v40  ;;  %v2064_v46 = vpop.f32.mrb[80].mxu0  ;;  %v4417_v47 = vpop.eup %3412  ;;  %v2441_v48 = vadd.f32 %v3411_v43, %v4414_v41  ;;  %v1872_v51 = vadd.f32 %v1871_v45, %v4376_v13 }
 0x2a0   : > { %v2253_v49 = vsub.f32 %v2055_v30, %v2221_v42  ;;  %v2349_v50 = vsub.f32 %v2057_v38, %v2221_v42  ;;  %v1873_v52 = vpop.f32.mrb[81].mxu1  ;;  %v2066_v53 = vpop.f32.mrb[81].mxu0 }
 0x2a1   : > { %v3415_v54 = vpop.eup %3414  ;;  %v2254_v55 = vsub.f32 %v2059_v39, %v2222_v44  ;;  %v2350_v56 = vsub.f32 %v2061_v40, %v2222_v44  ;;  %v1874_v57 = vadd.f32 %v1873_v52, %v4380_v14  ;;  %v1875_v58 = vpop.f32.mrb[82].mxu1  ;;  %3428 = vrcp.f32 %v2441_v48 }
 0x2a2   : > { %v2068_v59 = vpop.f32.mrb[82].mxu0  ;;  %v2442_v60 = vadd.f32 %v3415_v54, %v4417_v47  ;;  %v2291_v61 = vmul.f32 1.442695, %v2253_v49  ;;  %v2387_v11 = vmul.f32 1.442695, %v2349_v50  ;;  %v1877_v62 = vpop.f32.mrb[83].mxu1  ;;  %v2065_v2 = vadd.f32 %v2064_v46, %v1872_v51 }
 0x2a3   : > { %v2070_v12 = vpop.f32.mrb[83].mxu0  ;;  %v3417_v63 = vpop.eup %3416  ;;  %v2293_v0 = vmul.f32 1.442695, %v2254_v55  ;;  %v2389_v1 = vmul.f32 1.442695, %v2350_v56  ;;  %v2067_v3 = vadd.f32 %v2066_v53, %v1874_v57  ;;  %v1876_v8 = vadd.f32 %v1875_v58, %v4376_v13 }
 0x2a4   : > { %v2503_v7 = vmul.f32 %v3417_v63, %v4402_v4  ;;  %3430 = vrcp.f32 %v2442_v60  ;;  %v1878_v10 = vadd.f32 %v1877_v62, %v4380_v14  ;;  %v3419_v6 = vpop.eup %3418  ;;  %2191 = vst [vmem:[%s4387_s29 + $0x40] sm:$0xff] %v2065_v2 }
 0x2a5   : > { %3432 = vpow2.f32 %v2291_v61  ;;  %v2223_v16 = vmax.f32 %v2065_v2, %v2067_v3  ;;  %v4427_v17 = vpop.eup %3420  ;;  %v2504_v5 = vmul.f32 %v3419_v6, %v4405_v15  ;;  %v2069_v4 = vadd.f32 %v2068_v59, %v1876_v8 }
 0x2a6   : > { %2535 = vst [vmem:[%s4430_s7] sm:$0xff] %v2503_v7  ;;  %3434 = vpow2.f32 %v2387_v11  ;;  %v2071_v9 = vadd.f32 %v2070_v12, %v1878_v10  ;;  %v3423_v18 = vpop.eup %3422  ;;  %v1881_v21 = vpop.f32.mrb[84].mxu1 }
 0x2a7   : > { %3436 = vpow2.f32 %v2293_v0  ;;  %v2255_v19 = vsub.f32 %v2065_v2, %v2223_v16  ;;  %v2351_v20 = vsub.f32 %v2067_v3, %v2223_v16  ;;  %v2074_v22 = vpop.f32.mrb[84].mxu0  ;;  %v4434_v23 = vpop.eup %3424  ;;  %2536 = vst [vmem:[%s4430_s7 + $0x8] sm:$0xff] %v2504_v5  ;;  %v2443_v24 = vadd.f32 %v3423_v18, %v4427_v17  ;;  %2192 = vst [vmem:[%s4387_s29 + $0x48] sm:$0xff] %v2069_v4 }
 0x2a8   : > { %3438 = vpow2.f32 %v2389_v1  ;;  %v2224_v25 = vmax.f32 %v2069_v4, %v2071_v9  ;;  %v1882_v26 = vadd.f32 %v1881_v21, %v4376_v13  ;;  %v1883_v15 = vpop.f32.mrb[85].mxu1  ;;  %v2076_v27 = vpop.f32.mrb[85].mxu0 }
 0x2a9   : > { %v3427_v28 = vpop.eup %3426  ;;  %v2295_v29 = vmul.f32 1.442695, %v2255_v19  ;;  %v2391_v30 = vmul.f32 1.442695, %v2351_v20  ;;  %v1884_v31 = vadd.f32 %v1883_v15, %v4380_v14  ;;  %v1885_v32 = vpop.f32.mrb[86].mxu1  ;;  %3440 = vrcp.f32 %v2443_v24 }
 0x2aa   : > { %v2078_v33 = vpop.f32.mrb[86].mxu0  ;;  %v2444_v34 = vadd.f32 %v3427_v28, %v4434_v23  ;;  %v2256_v35 = vsub.f32 %v2069_v4, %v2224_v25  ;;  %v2352_v36 = vsub.f32 %v2071_v9, %v2224_v25  ;;  %v1887_v37 = vpop.f32.mrb[87].mxu1  ;;  %v2075_v39 = vadd.f32 %v2074_v22, %v1882_v26 }
 0x2ab   : > { %v2080_v38 = vpop.f32.mrb[87].mxu0  ;;  %3442 = vpow2.f32 %v2295_v29  ;;  %v2077_v40 = vadd.f32 %v2076_v27, %v1884_v31  ;;  %v1886_v42 = vadd.f32 %v1885_v32, %v4376_v13  ;;  %v3429_v43 = vpop.eup %3428  ;;  %v1888_v46 = vadd.f32 %v1887_v37, %v4380_v14 }
 0x2ac   : > { %3444 = vrcp.f32 %v2444_v34  ;;  %v2297_v44 = vmul.f32 1.442695, %v2256_v35  ;;  %v2393_v45 = vmul.f32 1.442695, %v2352_v36  ;;  %v2505_v48 = vmul.f32 %v3429_v43, %v4414_v41  ;;  %2193 = vst [vmem:[%s4387_s29 + $0x50] sm:$0xff] %v2075_v39 }
 0x2ad   : > { %3446 = vpow2.f32 %v2391_v30  ;;  %v2225_v49 = vmax.f32 %v2075_v39, %v2077_v40  ;;  %v2079_v50 = vadd.f32 %v2078_v33, %v1886_v42  ;;  %v2081_v52 = vadd.f32 %v2080_v38, %v1888_v46 }
 0x2ae   : > { %v3431_v51 = vpop.eup %3430  ;;  %3448 = vpow2.f32 %v2297_v44  ;;  %2537 = vst [vmem:[%s4430_s7 + $0x10] sm:$0xff] %v2505_v48  ;;  %v1891_v57 = vpop.f32.mrb[88].mxu1 }
 0x2af   : > { %v4446_v53 = vpop.eup %3432  ;;  %v2506_v54 = vmul.f32 %v3431_v51, %v4417_v47  ;;  %3450 = vpow2.f32 %v2393_v45  ;;  %v2257_v55 = vsub.f32 %v2075_v39, %v2225_v49  ;;  %v2353_v56 = vsub.f32 %v2077_v40, %v2225_v49  ;;  %2194 = vst [vmem:[%s4387_s29 + $0x58] sm:$0xff] %v2079_v50  ;;  %v2084_v58 = vpop.f32.mrb[88].mxu0 }
 0x2b0   : > { %v3435_v41 = vpop.eup %3434  ;;  %v2226_v59 = vmax.f32 %v2079_v50, %v2081_v52  ;;  %v1892_v60 = vadd.f32 %v1891_v57, %v4376_v13  ;;  %v1893_v61 = vpop.f32.mrb[89].mxu1 }
 0x2b1   : > { %v2086_v11 = vpop.f32.mrb[89].mxu0  ;;  %v4452_v62 = vpop.eup %3436  ;;  %2538 = vst [vmem:[%s4430_s7 + $0x18] sm:$0xff] %v2506_v54  ;;  %v2445_v12 = vadd.f32 %v3435_v41, %v4446_v53  ;;  %v2299_v63 = vmul.f32 1.442695, %v2257_v55  ;;  %v2395_v0 = vmul.f32 1.442695, %v2353_v56  ;;  %v1894_v47 = vadd.f32 %v1893_v61, %v4380_v14 }
 0x2b2   : > { %v1895_v1 = vpop.f32.mrb[90].mxu1  ;;  %v2088_v2 = vpop.f32.mrb[90].mxu0  ;;  %v2258_v7 = vsub.f32 %v2079_v50, %v2226_v59  ;;  %v2354_v8 = vsub.f32 %v2081_v52, %v2226_v59  ;;  %v2085_v10 = vadd.f32 %v2084_v58, %v1892_v60 }
 0x2b3   : > { %v3439_v3 = vpop.eup %3438  ;;  %v1896_v6 = vadd.f32 %v1895_v1, %v4376_v13  ;;  %v1897_v16 = vpop.f32.mrb[91].mxu1  ;;  %3452 = vrcp.f32 %v2445_v12  ;;  %v2087_v9 = vadd.f32 %v2086_v11, %v1894_v47 }
 0x2b4   : > { %v2090_v5 = vpop.f32.mrb[91].mxu0  ;;  %v2446_v4 = vadd.f32 %v3439_v3, %v4452_v62  ;;  %v1898_v18 = vadd.f32 %v1897_v16, %v4380_v14  ;;  %v3441_v19 = vpop.eup %3440  ;;  %3454 = vpow2.f32 %v2299_v63  ;;  %v2301_v20 = vmul.f32 1.442695, %v2258_v7  ;;  %2195 = vst [vmem:[%s4387_s29 + $0x60] sm:$0xff] %v2085_v10 }
 0x2b5   : > { %v2397_v21 = vmul.f32 1.442695, %v2354_v8  ;;  %v2089_v22 = vadd.f32 %v2088_v2, %v1896_v6  ;;  %v4461_v24 = vpop.eup %3442  ;;  %v2507_v25 = vmul.f32 %v3441_v19, %v4427_v17  ;;  %v2227_v26 = vmax.f32 %v2085_v10, %v2087_v9 }
 0x2b6   : > { %3456 = vrcp.f32 %v2446_v4  ;;  %v2091_v15 = vadd.f32 %v2090_v5, %v1898_v18  ;;  %v3445_v27 = vpop.eup %3444  ;;  %v1901_v32 = vpop.f32.mrb[92].mxu1 }
 0x2b7   : > { %3458 = vpow2.f32 %v2395_v0  ;;  %2196 = vst [vmem:[%s4387_s29 + $0x68] sm:$0xff] %v2089_v22  ;;  %v3447_v28 = vpop.eup %3446  ;;  %2539 = vst [vmem:[%s4430_s7 + $0x20] sm:$0xff] %v2507_v25  ;;  %v2508_v29 = vmul.f32 %v3445_v27, %v4434_v23  ;;  %v2259_v30 = vsub.f32 %v2085_v10, %v2227_v26  ;;  %v2355_v31 = vsub.f32 %v2087_v9, %v2227_v26  ;;  %v2094_v33 = vpop.f32.mrb[92].mxu0 }
 0x2b8   : > { %3460 = vpow2.f32 %v2301_v20  ;;  %v4467_v34 = vpop.eup %3448  ;;  %v2447_v17 = vadd.f32 %v3447_v28, %v4461_v24  ;;  %v2228_v35 = vmax.f32 %v2089_v22, %v2091_v15  ;;  %v1902_v36 = vadd.f32 %v1901_v32, %v4376_v13  ;;  %v1903_v37 = vpop.f32.mrb[93].mxu1 }
 0x2b9   : > { %3462 = vpow2.f32 %v2397_v21  ;;  %v2096_v38 = vpop.f32.mrb[93].mxu0  ;;  %v3451_v39 = vpop.eup %3450  ;;  %2540 = vst [vmem:[%s4430_s7 + $0x28] sm:$0xff] %v2508_v29  ;;  %v2303_v40 = vmul.f32 1.442695, %v2259_v30  ;;  %v2399_v42 = vmul.f32 1.442695, %v2355_v31  ;;  %v1904_v23 = vadd.f32 %v1903_v37, %v4380_v14 }
 0x2ba   : > { %v1905_v43 = vpop.f32.mrb[94].mxu1  ;;  %v2098_v44 = vpop.f32.mrb[94].mxu0  ;;  %3464 = vrcp.f32 %v2447_v17  ;;  %v2448_v45 = vadd.f32 %v3451_v39, %v4467_v34  ;;  %v2260_v46 = vsub.f32 %v2089_v22, %v2228_v35  ;;  %v2356_v48 = vsub.f32 %v2091_v15, %v2228_v35 }
 0x2bb   : > { %v1907_v49 = vpop.f32.mrb[95].mxu1  ;;  %v2100_v50 = vpop.f32.mrb[95].mxu0  ;;  %3466 = vpow2.f32 %v2303_v40  ;;  %v2095_v51 = vadd.f32 %v2094_v33, %v1902_v36  ;;  %v2097_v52 = vadd.f32 %v2096_v38, %v1904_v23  ;;  %v1906_v54 = vadd.f32 %v1905_v43, %v4376_v13 }
 0x2bc   : > { %3468 = vrcp.f32 %v2448_v45  ;;  %v2305_v55 = vmul.f32 1.442695, %v2260_v46  ;;  %v2401_v56 = vmul.f32 1.442695, %v2356_v48  ;;  %v1908_v57 = vadd.f32 %v1907_v49, %v4380_v14 }
 0x2bd   : > { %v3453_v58 = vpop.eup %3452  ;;  %3470 = vpow2.f32 %v2399_v42  ;;  %2197 = vst [vmem:[%s4387_s29 + $0x70] sm:$0xff] %v2095_v51  ;;  %v2229_v41 = vmax.f32 %v2095_v51, %v2097_v52  ;;  %v2099_v59 = vadd.f32 %v2098_v44, %v1906_v54 }
 0x2be   : > { %v4477_v60 = vpop.eup %3454  ;;  %v2509_v61 = vmul.f32 %v3453_v58, %v4446_v53  ;;  %3472 = vpow2.f32 %v2305_v55  ;;  %v2101_v11 = vadd.f32 %v2100_v50, %v1908_v57  ;;  %v1911_v47 = vpop.f32.mrb[96].mxu1 }
 0x2bf   : > { %3474 = vpow2.f32 %v2401_v56  ;;  %v2261_v63 = vsub.f32 %v2095_v51, %v2229_v41  ;;  %v2357_v0 = vsub.f32 %v2097_v52, %v2229_v41  ;;  %2198 = vst [vmem:[%s4387_s29 + $0x78] sm:$0xff] %v2099_v59  ;;  %v2104_v1 = vpop.f32.mrb[96].mxu0  ;;  %v1912_v8 = vadd.f32 %v1911_v47, %v4376_v13  ;;  %v1913_v10 = vpop.f32.mrb[97].mxu1 }
 0x2c0   : > { %v3457_v12 = vpop.eup %3456  ;;  %2541 = vst [vmem:[%s4430_s7 + $0x30] sm:$0xff] %v2509_v61  ;;  %v2230_v7 = vmax.f32 %v2099_v59, %v2101_v11  ;;  %v2106_v6 = vpop.f32.mrb[97].mxu0  ;;  %v1914_v9 = vadd.f32 %v1913_v10, %v4380_v14 }
 0x2c1   : > { %v3459_v2 = vpop.eup %3458  ;;  %v2510_v3 = vmul.f32 %v3457_v12, %v4452_v62  ;;  %v2307_v5 = vmul.f32 1.442695, %v2261_v63  ;;  %v2403_v4 = vmul.f32 1.442695, %v2357_v0  ;;  %v1915_v18 = vpop.f32.mrb[98].mxu1  ;;  %v2105_v22 = vadd.f32 %v2104_v1, %v1912_v8 }
 0x2c2   : > { %v4484_v53 = vpop.eup %3460  ;;  %v2449_v16 = vadd.f32 %v3459_v2, %v4477_v60  ;;  %v2108_v19 = vpop.f32.mrb[98].mxu0  ;;  %v2262_v21 = vsub.f32 %v2099_v59, %v2230_v7  ;;  %v2358_v62 = vsub.f32 %v2101_v11, %v2230_v7  ;;  %v1916_v25 = vadd.f32 %v1915_v18, %v4376_v13 }
 0x2c3   : > { %v3463_v20 = vpop.eup %3462  ;;  %2542 = vst [vmem:[%s4430_s7 + $0x38] sm:$0xff] %v2510_v3  ;;  %v1917_v26 = vpop.f32.mrb[99].mxu1  ;;  %v2107_v28 = vadd.f32 %v2106_v6, %v1914_v9  ;;  %2199 = vst [vmem:[%s4387_s29 + $0x80] sm:$0xff] %v2105_v22 }
 0x2c4   : > { %v2110_v15 = vpop.f32.mrb[99].mxu0  ;;  %3476 = vrcp.f32 %v2449_v16  ;;  %v2450_v27 = vadd.f32 %v3463_v20, %v4484_v53  ;;  %v1918_v29 = vadd.f32 %v1917_v26, %v4380_v14  ;;  %v3465_v30 = vpop.eup %3464  ;;  %v2309_v31 = vmul.f32 1.442695, %v2262_v21 }
 0x2c5   : > { %3478 = vpow2.f32 %v2307_v5  ;;  %v2405_v32 = vmul.f32 1.442695, %v2358_v62  ;;  %v2109_v33 = vadd.f32 %v2108_v19, %v1916_v25  ;;  %v4493_v17 = vpop.eup %3466  ;;  %v2511_v35 = vmul.f32 %v3465_v30, %v4461_v24 }
 0x2c6   : > { %3480 = vrcp.f32 %v2450_v27  ;;  %v2231_v36 = vmax.f32 %v2105_v22, %v2107_v28  ;;  %v2111_v37 = vadd.f32 %v2110_v15, %v1918_v29  ;;  %v3469_v38 = vpop.eup %3468  ;;  %v1921_v43 = vpop.f32.mrb[100].mxu1 }
 0x2c7   : > { %3482 = vpow2.f32 %v2403_v4  ;;  %2200 = vst [vmem:[%s4387_s29 + $0x88] sm:$0xff] %v2109_v33  ;;  %v3471_v39 = vpop.eup %3470  ;;  %2543 = vst [vmem:[%s4430_s7 + $0x40] sm:$0xff] %v2511_v35  ;;  %v2512_v40 = vmul.f32 %v3469_v38, %v4467_v34  ;;  %v2114_v44 = vpop.f32.mrb[100].mxu0  ;;  %v1922_v48 = vadd.f32 %v1921_v43, %v4376_v13 }
 0x2c8   : > { %3484 = vpow2.f32 %v2309_v31  ;;  %v2263_v42 = vsub.f32 %v2105_v22, %v2231_v36  ;;  %v2359_v23 = vsub.f32 %v2107_v28, %v2231_v36  ;;  %v4499_v45 = vpop.eup %3472  ;;  %v2451_v24 = vadd.f32 %v3471_v39, %v4493_v17  ;;  %v1923_v49 = vpop.f32.mrb[101].mxu1 }
 0x2c9   : > { %3486 = vpow2.f32 %v2405_v32  ;;  %v2232_v46 = vmax.f32 %v2109_v33, %v2111_v37  ;;  %v2116_v50 = vpop.f32.mrb[101].mxu0  ;;  %v3475_v51 = vpop.eup %3474  ;;  %2544 = vst [vmem:[%s4430_s7 + $0x48] sm:$0xff] %v2512_v40  ;;  %v1924_v34 = vadd.f32 %v1923_v49, %v4380_v14  ;;  %v2115_v11 = vadd.f32 %v2114_v44, %v1922_v48 }
 0x2ca   : > { %v2311_v52 = vmul.f32 1.442695, %v2263_v42  ;;  %v2407_v54 = vmul.f32 1.442695, %v2359_v23  ;;  %v1925_v55 = vpop.f32.mrb[102].mxu1  ;;  %v2118_v56 = vpop.f32.mrb[102].mxu0  ;;  %3488 = vrcp.f32 %v2451_v24  ;;  %v2452_v57 = vadd.f32 %v3475_v51, %v4499_v45 }
 0x2cb   : > { %v2264_v58 = vsub.f32 %v2109_v33, %v2232_v46  ;;  %v2360_v41 = vsub.f32 %v2111_v37, %v2232_v46  ;;  %v1927_v59 = vpop.f32.mrb[103].mxu1  ;;  %v2120_v61 = vpop.f32.mrb[103].mxu0  ;;  %v2117_v12 = vadd.f32 %v2116_v50, %v1924_v34  ;;  %v1926_v63 = vadd.f32 %v1925_v55, %v4376_v13  ;;  %2201 = vst [vmem:[%s4387_s29 + $0x90] sm:$0xff] %v2115_v11 }
 0x2cc   : > { %3490 = vpow2.f32 %v2311_v52  ;;  %v1928_v1 = vadd.f32 %v1927_v59, %v4380_v14 }
 0x2cd   : > { %3492 = vrcp.f32 %v2452_v57  ;;  %v2313_v0 = vmul.f32 1.442695, %v2264_v58  ;;  %v2409_v47 = vmul.f32 1.442695, %v2360_v41  ;;  %v2233_v3 = vmax.f32 %v2115_v11, %v2117_v12 }
 0x2ce   : > { %v3477_v2 = vpop.eup %3476  ;;  %3494 = vpow2.f32 %v2407_v54  ;;  %v2119_v7 = vadd.f32 %v2118_v56, %v1926_v63  ;;  %v2121_v6 = vadd.f32 %v2120_v61, %v1928_v1  ;;  %v1931_v9 = vpop.f32.mrb[104].mxu1 }
 0x2cf   : > { %v4509_v8 = vpop.eup %3478  ;;  %v2513_v10 = vmul.f32 %v3477_v2, %v4477_v60  ;;  %3496 = vpow2.f32 %v2313_v0  ;;  %v2265_v5 = vsub.f32 %v2115_v11, %v2233_v3  ;;  %v2361_v4 = vsub.f32 %v2117_v12, %v2233_v3  ;;  %v2124_v18 = vpop.f32.mrb[104].mxu0 }
 0x2d0   : > { %v3481_v16 = vpop.eup %3480  ;;  %3498 = vpow2.f32 %v2409_v47  ;;  %2202 = vst [vmem:[%s4387_s29 + $0x98] sm:$0xff] %v2119_v7  ;;  %v2234_v21 = vmax.f32 %v2119_v7, %v2121_v6  ;;  %v1932_v62 = vadd.f32 %v1931_v9, %v4376_v13  ;;  %v1933_v22 = vpop.f32.mrb[105].mxu1 }
 0x2d1   : > { %v3483_v19 = vpop.eup %3482  ;;  %2545 = vst [vmem:[%s4430_s7 + $0x50] sm:$0xff] %v2513_v10  ;;  %v2514_v20 = vmul.f32 %v3481_v16, %v4484_v53  ;;  %v2126_v25 = vpop.f32.mrb[105].mxu0  ;;  %v2315_v15 = vmul.f32 1.442695, %v2265_v5  ;;  %v2411_v27 = vmul.f32 1.442695, %v2361_v4  ;;  %v1934_v28 = vadd.f32 %v1933_v22, %v4380_v14 }
 0x2d2   : > { %v4516_v60 = vpop.eup %3484  ;;  %v2453_v26 = vadd.f32 %v3483_v19, %v4509_v8  ;;  %v1935_v29 = vpop.f32.mrb[106].mxu1  ;;  %v2266_v32 = vsub.f32 %v2119_v7, %v2234_v21  ;;  %v2362_v53 = vsub.f32 %v2121_v6, %v2234_v21  ;;  %v2125_v33 = vadd.f32 %v2124_v18, %v1932_v62 }
 0x2d3   : > { %v2128_v30 = vpop.f32.mrb[106].mxu0  ;;  %v3487_v31 = vpop.eup %3486  ;;  %2546 = vst [vmem:[%s4430_s7 + $0x58] sm:$0xff] %v2514_v20  ;;  %v1936_v35 = vadd.f32 %v1935_v29, %v4376_v13  ;;  %v2127_v39 = vadd.f32 %v2126_v25, %v1934_v28 }
 0x2d4   : > { %v1937_v36 = vpop.f32.mrb[107].mxu1  ;;  %v2130_v37 = vpop.f32.mrb[107].mxu0  ;;  %3500 = vrcp.f32 %v2453_v26  ;;  %v2454_v38 = vadd.f32 %v3487_v31, %v4516_v60  ;;  %v2317_v23 = vmul.f32 1.442695, %v2266_v32  ;;  %v2413_v43 = vmul.f32 1.442695, %v2362_v53 }
 0x2d5   : > { %v1938_v40 = vadd.f32 %v1937_v36, %v4380_v14  ;;  %v3489_v42 = vpop.eup %3488  ;;  %3502 = vpow2.f32 %v2315_v15  ;;  %2203 = vst [vmem:[%s4387_s29 + $0xa0] sm:$0xff] %v2125_v33  ;;  %v2129_v44 = vadd.f32 %v2128_v30, %v1936_v35  ;;  %v2235_v48 = vmax.f32 %v2125_v33, %v2127_v39 }
 0x2d6   : > { %v4525_v24 = vpop.eup %3490  ;;  %v2515_v46 = vmul.f32 %v3489_v42, %v4493_v17  ;;  %3504 = vrcp.f32 %v2454_v38  ;;  %v1941_v55 = vpop.f32.mrb[108].mxu1 }
 0x2d7   : > { %v2131_v49 = vadd.f32 %v2130_v37, %v1938_v40  ;;  %v3493_v50 = vpop.eup %3492  ;;  %3506 = vpow2.f32 %v2411_v27  ;;  %2204 = vst [vmem:[%s4387_s29 + $0xa8] sm:$0xff] %v2129_v44  ;;  %v2267_v54 = vsub.f32 %v2125_v33, %v2235_v48  ;;  %v2363_v34 = vsub.f32 %v2127_v39, %v2235_v48  ;;  %v2134_v56 = vpop.f32.mrb[108].mxu0 }
 0x2d8   : > { %v3495_v51 = vpop.eup %3494  ;;  %2547 = vst [vmem:[%s4430_s7 + $0x60] sm:$0xff] %v2515_v46  ;;  %v2516_v52 = vmul.f32 %v3493_v50, %v4499_v45  ;;  %3508 = vpow2.f32 %v2317_v23  ;;  %v1942_v41 = vadd.f32 %v1941_v55, %v4376_v13  ;;  %v1943_v59 = vpop.f32.mrb[109].mxu1 }
 0x2d9   : > { %v4531_v57 = vpop.eup %3496  ;;  %v2455_v17 = vadd.f32 %v3495_v51, %v4525_v24  ;;  %3510 = vpow2.f32 %v2413_v43  ;;  %v2236_v58 = vmax.f32 %v2129_v44, %v2131_v49  ;;  %v2136_v61 = vpop.f32.mrb[109].mxu0  ;;  %v2319_v12 = vmul.f32 1.442695, %v2267_v54 }
 0x2da   : > { %v3499_v11 = vpop.eup %3498  ;;  %2548 = vst [vmem:[%s4430_s7 + $0x68] sm:$0xff] %v2516_v52  ;;  %v2415_v63 = vmul.f32 1.442695, %v2363_v34  ;;  %v1944_v45 = vadd.f32 %v1943_v59, %v4380_v14  ;;  %v1945_v0 = vpop.f32.mrb[110].mxu1  ;;  %v2135_v6 = vadd.f32 %v2134_v56, %v1942_v41 }
 0x2db   : > { %v2138_v47 = vpop.f32.mrb[110].mxu0  ;;  %3512 = vrcp.f32 %v2455_v17  ;;  %v2456_v1 = vadd.f32 %v3499_v11, %v4531_v57  ;;  %v2268_v2 = vsub.f32 %v2129_v44, %v2236_v58  ;;  %v2364_v3 = vsub.f32 %v2131_v49, %v2236_v58  ;;  %v1947_v7 = vpop.f32.mrb[111].mxu1 }
 0x2dc   : > { %v2140_v10 = vpop.f32.mrb[111].mxu0  ;;  %3514 = vpow2.f32 %v2319_v12  ;;  %v2137_v16 = vadd.f32 %v2136_v61, %v1944_v45  ;;  %v1946_v5 = vadd.f32 %v1945_v0, %v4376_v13  ;;  %v1948_v18 = vadd.f32 %v1947_v7, %v4380_v14  ;;  %2205 = vst [vmem:[%s4387_s29 + $0xb0] sm:$0xff] %v2135_v6 }
 0x2dd   : > { %3516 = vrcp.f32 %v2456_v1  ;;  %v2321_v4 = vmul.f32 1.442695, %v2268_v2  ;;  %v2417_v9 = vmul.f32 1.442695, %v2364_v3 }
 0x2de   : > { %v3501_v19 = vpop.eup %3500  ;;  %3518 = vpow2.f32 %v2415_v63  ;;  %v2237_v20 = vmax.f32 %v2135_v6, %v2137_v16  ;;  %v2139_v21 = vadd.f32 %v2138_v47, %v1946_v5  ;;  %v2141_v25 = vadd.f32 %v2140_v10, %v1948_v18  ;;  %v1951_v28 = vpop.f32.mrb[112].mxu1 }
 0x2df   : > { %v4541_v62 = vpop.eup %3502  ;;  %v2517_v22 = vmul.f32 %v3501_v19, %v4509_v8  ;;  %3520 = vpow2.f32 %v2321_v4  ;;  %v2144_v29 = vpop.f32.mrb[112].mxu0  ;;  %v1952_v53 = vadd.f32 %v1951_v28, %v4376_v13 }
 0x2e0   : > { %v3505_v26 = vpop.eup %3504  ;;  %3522 = vpow2.f32 %v2417_v9  ;;  %v2269_v15 = vsub.f32 %v2135_v6, %v2237_v20  ;;  %v2365_v27 = vsub.f32 %v2137_v16, %v2237_v20  ;;  %2206 = vst [vmem:[%s4387_s29 + $0xb8] sm:$0xff] %v2139_v21  ;;  %v2238_v32 = vmax.f32 %v2139_v21, %v2141_v25  ;;  %v1953_v33 = vpop.f32.mrb[113].mxu1 }
 0x2e1   : > { %v3507_v30 = vpop.eup %3506  ;;  %2549 = vst [vmem:[%s4430_s7 + $0x70] sm:$0xff] %v2517_v22  ;;  %v2518_v31 = vmul.f32 %v3505_v26, %v4516_v60  ;;  %v2146_v35 = vpop.f32.mrb[113].mxu0  ;;  %v1954_v39 = vadd.f32 %v1953_v33, %v4380_v14  ;;  %v2145_v44 = vadd.f32 %v2144_v29, %v1952_v53 }
 0x2e2   : > { %v4548_v8 = vpop.eup %3508  ;;  %v2457_v36 = vadd.f32 %v3507_v30, %v4541_v62  ;;  %v2323_v37 = vmul.f32 1.442695, %v2269_v15  ;;  %v2419_v38 = vmul.f32 1.442695, %v2365_v27  ;;  %v1955_v40 = vpop.f32.mrb[114].mxu1  ;;  %v2270_v43 = vsub.f32 %v2139_v21, %v2238_v32 }
 0x2e3   : > { %v2148_v42 = vpop.f32.mrb[114].mxu0  ;;  %v3511_v23 = vpop.eup %3510  ;;  %2550 = vst [vmem:[%s4430_s7 + $0x78] sm:$0xff] %v2518_v31  ;;  %v2366_v60 = vsub.f32 %v2141_v25, %v2238_v32  ;;  %v1956_v46 = vadd.f32 %v1955_v40, %v4376_v13  ;;  %v2147_v51 = vadd.f32 %v2146_v35, %v1954_v39  ;;  %2207 = vst [vmem:[%s4387_s29 + $0xc0] sm:$0xff] %v2145_v44 }
 0x2e4   : > { %v1957_v48 = vpop.f32.mrb[115].mxu1  ;;  %v2150_v49 = vpop.f32.mrb[115].mxu0  ;;  %3524 = vrcp.f32 %v2457_v36  ;;  %v2458_v50 = vadd.f32 %v3511_v23, %v4548_v8  ;;  %v2325_v34 = vmul.f32 1.442695, %v2270_v43 }
 0x2e5   : > { %v1958_v52 = vadd.f32 %v1957_v48, %v4380_v14  ;;  %v3513_v54 = vpop.eup %3512  ;;  %3526 = vpow2.f32 %v2323_v37  ;;  %v2421_v55 = vmul.f32 1.442695, %v2366_v60  ;;  %v2149_v56 = vadd.f32 %v2148_v42, %v1956_v46 }
 0x2e6   : > { %v4557_v17 = vpop.eup %3514  ;;  %v2519_v58 = vmul.f32 %v3513_v54, %v4525_v24  ;;  %3528 = vrcp.f32 %v2458_v50  ;;  %v2239_v41 = vmax.f32 %v2145_v44, %v2147_v51  ;;  %v1961_v0 = vpop.f32.mrb[116].mxu1 }
 0x2e7   : > { %v2151_v59 = vadd.f32 %v2150_v49, %v1958_v52  ;;  %v3517_v61 = vpop.eup %3516  ;;  %3530 = vpow2.f32 %v2419_v38  ;;  %2208 = vst [vmem:[%s4387_s29 + $0xc8] sm:$0xff] %v2149_v56  ;;  %v2154_v47 = vpop.f32.mrb[116].mxu0  ;;  %v1962_v3 = vadd.f32 %v1961_v0, %v4376_v13 }
 0x2e8   : > { %v3519_v11 = vpop.eup %3518  ;;  %2551 = vst [vmem:[%s4430_s7 + $0x80] sm:$0xff] %v2519_v58  ;;  %v2520_v12 = vmul.f32 %v3517_v61, %v4531_v57  ;;  %3532 = vpow2.f32 %v2325_v34  ;;  %v2271_v63 = vsub.f32 %v2145_v44, %v2239_v41  ;;  %v2367_v45 = vsub.f32 %v2147_v51, %v2239_v41  ;;  %v1963_v7 = vpop.f32.mrb[117].mxu1 }
 0x2e9   : > { %v4563_v1 = vpop.eup %3520  ;;  %v2459_v24 = vadd.f32 %v3519_v11, %v4557_v17  ;;  %3534 = vpow2.f32 %v2421_v55  ;;  %v2240_v2 = vmax.f32 %v2149_v56, %v2151_v59  ;;  %v2156_v10 = vpop.f32.mrb[117].mxu0  ;;  %v1964_v57 = vadd.f32 %v1963_v7, %v4380_v14 }
 0x2ea   : > { %v3523_v6 = vpop.eup %3522  ;;  %2552 = vst [vmem:[%s4430_s7 + $0x88] sm:$0xff] %v2520_v12  ;;  %v2327_v16 = vmul.f32 1.442695, %v2271_v63  ;;  %v2423_v5 = vmul.f32 1.442695, %v2367_v45  ;;  %v1965_v4 = vpop.f32.mrb[118].mxu1  ;;  %v2155_v25 = vadd.f32 %v2154_v47, %v1962_v3 }
 0x2eb   : > { %v2158_v9 = vpop.f32.mrb[118].mxu0  ;;  %3536 = vrcp.f32 %v2459_v24  ;;  %v2460_v18 = vadd.f32 %v3523_v6, %v4563_v1  ;;  %v2272_v19 = vsub.f32 %v2149_v56, %v2240_v2  ;;  %v2368_v20 = vsub.f32 %v2151_v59, %v2240_v2  ;;  %v1967_v21 = vpop.f32.mrb[119].mxu1 }
 0x2ec   : > { %v2160_v22 = vpop.f32.mrb[119].mxu0  ;;  %3538 = vpow2.f32 %v2327_v16  ;;  %v2157_v26 = vadd.f32 %v2156_v10, %v1964_v57  ;;  %v1966_v15 = vadd.f32 %v1965_v4, %v4376_v13  ;;  %v1968_v29 = vadd.f32 %v1967_v21, %v4380_v14  ;;  %2209 = vst [vmem:[%s4387_s29 + $0xd0] sm:$0xff] %v2155_v25 }
 0x2ed   : > { %3540 = vrcp.f32 %v2460_v18  ;;  %v2329_v27 = vmul.f32 1.442695, %v2272_v19  ;;  %v2425_v28 = vmul.f32 1.442695, %v2368_v20 }
 0x2ee   : > { %v3525_v30 = vpop.eup %3524  ;;  %3542 = vpow2.f32 %v2423_v5  ;;  %v2241_v31 = vmax.f32 %v2155_v25, %v2157_v26  ;;  %v2159_v32 = vadd.f32 %v2158_v9, %v1966_v15  ;;  %v2161_v35 = vadd.f32 %v2160_v22, %v1968_v29  ;;  %v1971_v39 = vpop.f32.mrb[120].mxu1 }
 0x2ef   : > { %v4573_v53 = vpop.eup %3526  ;;  %v2521_v33 = vmul.f32 %v3525_v30, %v4541_v62  ;;  %3544 = vpow2.f32 %v2329_v27  ;;  %v2164_v40 = vpop.f32.mrb[120].mxu0  ;;  %v1972_v60 = vadd.f32 %v1971_v39, %v4376_v13 }
 0x2f0   : > { %v3529_v36 = vpop.eup %3528  ;;  %3546 = vpow2.f32 %v2425_v28  ;;  %v2273_v37 = vsub.f32 %v2155_v25, %v2241_v31  ;;  %v2369_v38 = vsub.f32 %v2157_v26, %v2241_v31  ;;  %2210 = vst [vmem:[%s4387_s29 + $0xd8] sm:$0xff] %v2159_v32  ;;  %v2242_v43 = vmax.f32 %v2159_v32, %v2161_v35  ;;  %v1973_v44 = vpop.f32.mrb[121].mxu1 }
 0x2f1   : > { %v3531_v42 = vpop.eup %3530  ;;  %2553 = vst [vmem:[%s4430_s7 + $0x90] sm:$0xff] %v2521_v33  ;;  %v2522_v23 = vmul.f32 %v3529_v36, %v4548_v8  ;;  %v2166_v46 = vpop.f32.mrb[121].mxu0  ;;  %v1974_v51 = vadd.f32 %v1973_v44, %v4380_v14  ;;  %v2165_v56 = vadd.f32 %v2164_v40, %v1972_v60 }
 0x2f2   : > { %v4580_v62 = vpop.eup %3532  ;;  %v2461_v48 = vadd.f32 %v3531_v42, %v4573_v53  ;;  %v2331_v49 = vmul.f32 1.442695, %v2273_v37  ;;  %v2427_v50 = vmul.f32 1.442695, %v2369_v38  ;;  %v1975_v52 = vpop.f32.mrb[122].mxu1  ;;  %v2274_v55 = vsub.f32 %v2159_v32, %v2242_v43 }
 0x2f3   : > { %v2168_v54 = vpop.f32.mrb[122].mxu0  ;;  %v3535_v34 = vpop.eup %3534  ;;  %2554 = vst [vmem:[%s4430_s7 + $0x98] sm:$0xff] %v2522_v23  ;;  %v2370_v8 = vsub.f32 %v2161_v35, %v2242_v43  ;;  %v1976_v58 = vadd.f32 %v1975_v52, %v4376_v13  ;;  %v2167_v11 = vadd.f32 %v2166_v46, %v1974_v51  ;;  %2211 = vst [vmem:[%s4387_s29 + $0xe0] sm:$0xff] %v2165_v56 }
 0x2f4   : > { %v1977_v41 = vpop.f32.mrb[123].mxu1  ;;  %v2170_v59 = vpop.f32.mrb[123].mxu0  ;;  %3548 = vrcp.f32 %v2461_v48  ;;  %v2462_v61 = vadd.f32 %v3535_v34, %v4580_v62  ;;  %v2333_v45 = vmul.f32 1.442695, %v2274_v55 }
 0x2f5   : > { %v1978_v12 = vadd.f32 %v1977_v41, %v4380_v14  ;;  %v3537_v63 = vpop.eup %3536  ;;  %3550 = vpow2.f32 %v2331_v49  ;;  %v2429_v0 = vmul.f32 1.442695, %v2370_v8  ;;  %v2169_v47 = vadd.f32 %v2168_v54, %v1976_v58 }
 0x2f6   : > { %v4589_v24 = vpop.eup %3538  ;;  %v2523_v2 = vmul.f32 %v3537_v63, %v4557_v17  ;;  %3552 = vrcp.f32 %v2462_v61  ;;  %v2243_v3 = vmax.f32 %v2165_v56, %v2167_v11  ;;  %v1981_v4 = vpop.f32.mrb[124].mxu1 }
 0x2f7   : > { %v2171_v7 = vadd.f32 %v2170_v59, %v1978_v12  ;;  %v3541_v10 = vpop.eup %3540  ;;  %3554 = vpow2.f32 %v2427_v50  ;;  %2212 = vst [vmem:[%s4387_s29 + $0xe8] sm:$0xff] %v2169_v47  ;;  %v2174_v9 = vpop.f32.mrb[124].mxu0  ;;  %v1982_v20 = vadd.f32 %v1981_v4, %v4376_v13 }
 0x2f8   : > { %v3543_v6 = vpop.eup %3542  ;;  %2555 = vst [vmem:[%s4430_s7 + $0xa0] sm:$0xff] %v2523_v2  ;;  %v2524_v16 = vmul.f32 %v3541_v10, %v4563_v1  ;;  %3556 = vpow2.f32 %v2333_v45  ;;  %v2275_v5 = vsub.f32 %v2165_v56, %v2243_v3  ;;  %v2371_v57 = vsub.f32 %v2167_v11, %v2243_v3  ;;  %v1983_v21 = vpop.f32.mrb[125].mxu1 }
 0x2f9   : > { %v4595_v18 = vpop.eup %3544  ;;  %v2463_v17 = vadd.f32 %v3543_v6, %v4589_v24  ;;  %3558 = vpow2.f32 %v2429_v0  ;;  %v2244_v19 = vmax.f32 %v2169_v47, %v2171_v7  ;;  %v2176_v22 = vpop.f32.mrb[125].mxu0  ;;  %v1984_v15 = vadd.f32 %v1983_v21, %v4380_v14 }
 0x2fa   : > { %v3547_v25 = vpop.eup %3546  ;;  %2556 = vst [vmem:[%s4430_s7 + $0xa8] sm:$0xff] %v2524_v16  ;;  %v2335_v1 = vmul.f32 1.442695, %v2275_v5  ;;  %v2431_v26 = vmul.f32 1.442695, %v2371_v57  ;;  %v1985_v27 = vpop.f32.mrb[126].mxu1  ;;  %v2175_v35 = vadd.f32 %v2174_v9, %v1982_v20 }
 0x2fb   : > { %v2178_v28 = vpop.f32.mrb[126].mxu0  ;;  %3560 = vrcp.f32 %v2463_v17  ;;  %v2464_v29 = vadd.f32 %v3547_v25, %v4595_v18  ;;  %v2276_v30 = vsub.f32 %v2169_v47, %v2244_v19  ;;  %v2372_v31 = vsub.f32 %v2171_v7, %v2244_v19  ;;  %v1987_v32 = vpop.f32.mrb[127].mxu1 }
 0x2fc   : > { %v2180_v33 = vpop.f32.mrb[127].mxu0  ;;  %3562 = vpow2.f32 %v2335_v1  ;;  %v2177_v36 = vadd.f32 %v2176_v22, %v1984_v15  ;;  %v1986_v37 = vadd.f32 %v1985_v27, %v4376_v13  ;;  %v1988_v40 = vadd.f32 %v1987_v32, %v4380_v14  ;;  %2213 = vst [vmem:[%s4387_s29 + $0xf0] sm:$0xff] %v2175_v35 }
 0x2fd   : > { %3564 = vrcp.f32 %v2464_v29  ;;  %v2337_v38 = vmul.f32 1.442695, %v2276_v30  ;;  %v2433_v39 = vmul.f32 1.442695, %v2372_v31 }
 0x2fe   : > { %v3549_v42 = vpop.eup %3548  ;;  %3566 = vpow2.f32 %v2431_v26  ;;  %v2245_v13 = vmax.f32 %v2175_v35, %v2177_v36  ;;  %v2179_v23 = vadd.f32 %v2178_v28, %v1986_v37  ;;  %v2181_v44 = vadd.f32 %v2180_v33, %v1988_v40 }
 0x2ff   : > { %v4616_v43 = vpop.eup %3550  ;;  %v2525_v60 = vmul.f32 %v3549_v42, %v4573_v53  ;;  %3568 = vpow2.f32 %v2337_v38 }
 0x300   : > { %v3553_v46 = vpop.eup %3552  ;;  %3570 = vpow2.f32 %v2433_v39  ;;  %v2277_v14 = vsub.f32 %v2175_v35, %v2245_v13  ;;  %v2373_v48 = vsub.f32 %v2177_v36, %v2245_v13  ;;  %2214 = vst [vmem:[%s4387_s29 + $0xf8] sm:$0xff] %v2179_v23  ;;  %v2246_v51 = vmax.f32 %v2179_v23, %v2181_v44 }
 0x301   : > { %v3555_v49 = vpop.eup %3554  ;;  %2557 = vst [vmem:[%s4430_s7 + $0xb0] sm:$0xff] %v2525_v60  ;;  %v2526_v50 = vmul.f32 %v3553_v46, %v4580_v62 }
 0x302   : > { %3747 = shalt.err (!%p3744_p0)
}
 0x303   : > { %s3748_s19 = scalar_lea.hbm %s4610_s17, 4096  ;;  %s3752_s11 = scalar_lea.hbm %s4727_s5, 8192 }
 0x304   : > { %p3749_p4 = scmp.ne.s32.totalorder %s4610_s17, %s3748_s19  ;;  %p3753_p12 = scmp.lt.u32.totalorder %s4610_s17, %s4727_s5 }
 0x305   : > { %p3754_p1 = scmp.lt.u32.totalorder %s3752_s11, %s3748_s19  ;;  %p3756_p10 = scmp.lt.u32.totalorder %s3748_s19, %s4610_s17 }
 0x306   : > { %p3750_p13 = pnand %p3749_p4, %p4085_p5 }
 0x307   : > { %p3755_p11 = por %p3754_p1, %p3753_p12 }
 0x308   : > { %p3751_p6 = pneg %p3750_p13 }
 0x309   : > { %p3757_p3 = por %p3756_p10, %p3755_p11 }
 0x30b   : > { %p3758_p2 = pnand %p3757_p3, %p3751_p6 }
 0x30d   : > { %3761 = shalt.err (!%p3758_p2)
}
 0x30e   : > { %s3868_s14 = smov 128   ;;  %s3869_s13 = smov 8   ;;  %v3557_v53 = vpop.eup %3556  ;;  %v2465_v62 = vadd.f32 %v3555_v49, %v4616_v43  ;;  %v2339_v52 = vmul.f32 1.442695, %v2277_v14  ;;  %2558 = vst [vmem:[%s4430_s7 + $0xb8] sm:$0xff] %v2526_v50  ;;  %v2278_v55 = vsub.f32 %v2179_v23, %v2246_v51  ;;  %v2374_v8 = vsub.f32 %v2181_v44, %v2246_v51 }
 0x30f   : > { %3106 = dma.vmem_to_hbm [thread:$0]  (%p4085_p5), %s4613_s8, 4096, %s4610_s17, %s2568_s1, %s3868_s14, %s3868_s14, %s3869_s13   ;;  %v3559_v54 = vpop.eup %3558  ;;  %v2435_v34 = vmul.f32 1.442695, %v2373_v48 }
 0x310   : > { %3572 = vrcp.f32 %v2465_v62  ;;  %v2466_v56 = vadd.f32 %v3559_v54, %v3557_v53  ;;  %v3561_v58 = vpop.eup %3560  ;;  %v2341_v41 = vmul.f32 1.442695, %v2278_v55  ;;  %v2437_v59 = vmul.f32 1.442695, %v2374_v8  ;;  %s2606_s8 = sshll.u32 %s4430_s7, 4  ;;  %s4667_s27 = scalar_lea.hbm %s4728_s6, %s2958_s9  ;;  %s4669_s8 = int_to_ptr.vmem [resolvable:$true] %s2606_s8 }
 0x311   : > { %3574 = vpow2.f32 %v2339_v52  ;;  %v3563_v61 = vpop.eup %3562  ;;  %v2527_v11 = vmul.f32 %v3561_v58, %v4589_v24  ;;  %s2573_s30 = scalar_lea.sflag [#allocation13], %s4143_s16  ;;  %s3762_s18 = scalar_lea.vmem %s4669_s8, 4096 }
 0x312   : > { %3576 = vrcp.f32 %v2466_v56  ;;  %v3565_v12 = vpop.eup %3564  ;;  %p3763_p8 = scmp.ne.s32.totalorder %s4669_s8, %s3762_s18  ;;  %s3870_s19 = smov [#allocation12]  }
 0x313   : > { %3578 = vpow2.f32 %v2435_v34  ;;  %v3567_v63 = vpop.eup %3566  ;;  %2559 = vst [vmem:[%s4430_s7 + $0xc0] sm:$0xff] %v2527_v11  ;;  %v2528_v45 = vmul.f32 %v3565_v12, %v4595_v18  ;;  %s3766_s28 = sshll.u32 %s3870_s19, 4  ;;  %s3767_s28 = int_to_ptr.vmem [resolvable:$false] %s3766_s28 }
 0x314   : > { %3580 = vpow2.f32 %v2341_v41  ;;  %v3569_v0 = vpop.eup %3568  ;;  %v2467_v47 = vadd.f32 %v3567_v63, %v3563_v61  ;;  %p3764_p7 = pnand %p3763_p8, %p4085_p5  ;;  %s3768_s24 = scalar_lea.vmem %s3767_s28, 8192 }
 0x315   : > { %3582 = vpow2.f32 %v2437_v59  ;;  %v3571_v2 = vpop.eup %3570  ;;  %2560 = vst [vmem:[%s4430_s7 + $0xc8] sm:$0xff] %v2528_v45  ;;  %p3769_p0 = scmp.lt.s32.totalorder %s4669_s8, %s3767_s28  ;;  %p3770_p4 = scmp.lt.s32.totalorder %s3768_s24, %s3762_s18 }
 0x316   : > { %3584 = vrcp.f32 %v2467_v47  ;;  %v2468_v3 = vadd.f32 %v3571_v2, %v3569_v0  ;;  %p3765_p9 = pneg %p3764_p7 }
 0x317   : > { %p3771_p13 = por %p3770_p4, %p3769_p0 }
 0x318   : > { %3586 = vrcp.f32 %v2468_v3 }
 0x319   : > { %p3772_p6 = pnand %p3771_p13, %p3765_p9 }
 0x31a   : > { %v3573_v7 = vpop.eup %3572 }
 0x31b   : > { %v3575_v24 = vpop.eup %3574  ;;  %v2529_v10 = vmul.f32 %v3573_v7, %v4616_v43 }
 0x31c   : > { %v3577_v6 = vpop.eup %3576 }
 0x31d   : > { %v3579_v16 = vpop.eup %3578  ;;  %2561 = vst [vmem:[%s4430_s7 + $0xd0] sm:$0xff] %v2529_v10  ;;  %v2530_v5 = vmul.f32 %v3577_v6, %v3557_v53 }
 0x31e   : > { %v3581_v57 = vpop.eup %3580  ;;  %v2469_v4 = vadd.f32 %v3579_v16, %v3575_v24 }
 0x31f   : > { %v3583_v9 = vpop.eup %3582  ;;  %2562 = vst [vmem:[%s4430_s7 + $0xd8] sm:$0xff] %v2530_v5 }
 0x320   : > { %3588 = vrcp.f32 %v2469_v4  ;;  %v2470_v18 = vadd.f32 %v3583_v9, %v3581_v57  ;;  %v3585_v17 = vpop.eup %3584 }
 0x321   : > { %v2531_v19 = vmul.f32 %v3585_v17, %v3563_v61 }
 0x322   : > { %3590 = vrcp.f32 %v2470_v18  ;;  %v3587_v20 = vpop.eup %3586 }
 0x323   : > { %2563 = vst [vmem:[%s4430_s7 + $0xe0] sm:$0xff] %v2531_v19  ;;  %v2532_v21 = vmul.f32 %v3587_v20, %v3569_v0 }
 0x325   : > { %2564 = vst [vmem:[%s4430_s7 + $0xe8] sm:$0xff] %v2532_v21 }
 0x32a   : > { %v3589_v22 = vpop.eup %3588 }
 0x32b   : > { %v2533_v25 = vmul.f32 %v3589_v22, %v3575_v24 }
 0x32c   : > { %v3591_v1 = vpop.eup %3590 }
 0x32d   : > { %2565 = vst [vmem:[%s4430_s7 + $0xf0] sm:$0xff] %v2533_v25  ;;  %v2534_v26 = vmul.f32 %v3591_v1, %v3581_v57 }
 0x32f   : > { %2566 = vst [vmem:[%s4430_s7 + $0xf8] sm:$0xff] %v2534_v26 }
 0x330   : > { %3775 = shalt.err (!%p3772_p6)
}
 0x331   : > { %s3776_s7 = scalar_lea.hbm %s4667_s27, 4096  ;;  %s3780_s11 = scalar_lea.hbm %s4728_s6, 8192 }
 0x332   : > { %p3777_p12 = scmp.ne.s32.totalorder %s4667_s27, %s3776_s7  ;;  %p3781_p10 = scmp.lt.u32.totalorder %s4667_s27, %s4728_s6 }
 0x333   : > { %p3782_p3 = scmp.lt.u32.totalorder %s3780_s11, %s3776_s7  ;;  %p3784_p8 = scmp.lt.u32.totalorder %s3776_s7, %s4667_s27 }
 0x334   : > { %p3778_p1 = pnand %p3777_p12, %p4085_p5 }
 0x335   : > { %p3783_p2 = por %p3782_p3, %p3781_p10 }
 0x336   : > { %p3779_p11 = pneg %p3778_p1 }
 0x337   : > { %p3785_p7 = por %p3784_p8, %p3783_p2 }
 0x339   : > { %p3786_p9 = pnand %p3785_p7, %p3779_p11 }
 0x33b   : > { %3789 = shalt.err (!%p3786_p9)
}
 0x33c   : > { %3107 = dma.vmem_to_hbm [thread:$0]  (%p4085_p5), %s4669_s8, 4096, %s4667_s27, %s2573_s30, %s3868_s14, %s3868_s14, %s3869_s13  }
 0x33d PF: > { %s4752_s17 = sld [smem:[#allocation19_spill]]  ;;  %s4753_s1 = sld [smem:[#allocation20_spill]] }
 0x33e   : > { %p4755_p4 = scmp.ge.s32.totalorder %s3856_s26, 2 }
 0x343   : > { %s2621_s18 = sand.u32 1, %s4752_s17   ;;  %p4754_p0 = scmp.ne.s32.totalorder %s4753_s1, 0 }
 0x344   : > { %s2622_s19 = scalar_lea.sflag [#allocation4], %s2621_s18 }
 0x345   : > { %p3128_p13 = pnand %p4755_p4, %p4754_p0 }
 0x347   : > { %3827 = dma.done.wait (!%p3128_p13), %s2622_s19, 4096  }
 0x348   : > { %3829 = vsyncadd (!%p3128_p13), %s2622_s19, 4294963200  ;;  %s2631_s12 = scalar_lea.sflag [#allocation13], %s2621_s18 }
 0x349   : > { %3831 = dma.done.wait (!%p3128_p13), %s2631_s12, 4096  }
 0x34a   : > { %3833 = vsyncadd (!%p3128_p13), %s2631_s12, 4294963200  ;;  %s28_s26 = sadd.s32 1, %s3856_s26   ;;  %s4756_s21 = smov %s3840_s22 }
 0x34b   : > { %p25_p6 = scmp.ge.s32.totalorder %s28_s26, 4   ;;  %s4757_s22 = smov %s3844_s23 }
 0x34c   : > { %s4758_s23 = smov %s4094_s10  ;;  %s4759_s24 = smov %s3852_s25 }
 0x34d   : > { %s4760_s25 = smov %s4762_s20  ;;  %27 = sbr.rel (!%p25_p6) target bundleno = 12 (0xc), region = 118 }
 0x354   :  { %2636 = vsyncpa [#allocation3], 1 }
 0x355   :  { %2638 = vsyncpa [#allocation3 + $0x1], 1 }
 0x356   :  { %2639 = vsyncpa [#allocation6], 1 }
 0x357   :  { %2640 = vsyncpa [#allocation9], 1 }
 0x358   :  { %2641 = vsyncpa [#allocation4], 1 }
 0x359   :  { %2643 = vsyncpa [#allocation4 + $0x1], 1 }
 0x35a   :  { %2644 = vsyncpa [#allocation13], 1 }
 0x35b   :  { %2646 = vsyncpa [#allocation13 + $0x1], 1 }

</bundles_post_ra>
